<compile_context>
chip_gen: v6e
topology: v6e:2x2x1
jax: 0.10.0
libtpu: 0.0.40
codegen_flags: <defaults>
</compile_context>

<pallas_src>
import functools

import jax
import jax.numpy as jnp
from jax import lax
from jax.experimental import pallas as pl
from jax.experimental.pallas import tpu as pltpu

NEG_SLOPE = 0.01  # F.leaky_relu_ default / GATConv(negative_slope=0.01)


def _leaky_relu(v):
    return jnp.where(v > 0, v, NEG_SLOPE * v)


def _elu(v):
    # TODO(synk): jnp.expm1 would be marginally more precise; exp-1 kept for
    # guaranteed Mosaic lowering (matches the previous clean-running version).
    return jnp.where(v > 0, v, jnp.exp(v) - 1.0)


def _scatter_dot(g, v):
    """sum_e g[e, n] * v[e, :]  ==  g^T @ v without materializing g^T (MXU)."""
    return lax.dot_general(g, v, (((0,), (0,)), ((), ())),
                           preferred_element_type=jnp.float32)


def _gather_rows(g, v):
    """v[idx[e], :] via the one-hot matrix g (E, N) @ v (N, k) on the MXU."""
    return jnp.dot(g, v, preferred_element_type=jnp.float32)


def _one_hot(idx_col, rows, num):
    """Exact f32 0/1 one-hot built on-core from an int32 (rows, 1) index column."""
    cols = lax.broadcasted_iota(jnp.int32, (rows, num), 1)
    return jnp.where(cols == idx_col, jnp.float32(1.0), jnp.float32(0.0))


def _segment_softmax(logit, g):
    """Softmax of per-edge logits (E,1) grouped by the destination one-hot g (E,Nd).

    Per-edge gathers run on the MXU; the mask is a single FMA (no select).
    """
    masked = logit + (g - 1.0) * 1e30                               # (E, Nd)
    seg_max = jnp.max(masked, axis=0, keepdims=True)                # (1, Nd)
    edge_max = lax.dot_general(g, seg_max, (((1,), (1,)), ((), ())),
                               preferred_element_type=jnp.float32)  # (E, 1) gather
    expv = jnp.exp(logit - edge_max)                                # (E, 1)
    denom = _scatter_dot(g, expv)                                   # (Nd, 1)
    edge_denom = _gather_rows(g, denom)                             # (E, 1)
    # Approx reciprocal runs on the EUP slot; use approx=False for parity checks.
    return expv * pl.reciprocal(edge_denom, approx=True)            # (E, 1)


# ---------------------------------------------------------------------------
# Value-level building blocks (all traced inside the single fused kernel)
# ---------------------------------------------------------------------------
def _gate_conv(x, edge_attr, gsrc, gdst, w1x_t, w1e_t, w2_t, att_l, att_r, bias):
    # lin1's node part applied per node (N*C^2), then gathered per edge.
    x1 = jnp.dot(x, w1x_t, preferred_element_type=jnp.float32)          # (N, C)
    h = _leaky_relu(
        _gather_rows(gsrc, x1)
        + jnp.dot(edge_attr, w1e_t, preferred_element_type=jnp.float32))  # (E, C)
    a_j = jnp.sum(h * att_l, axis=-1, keepdims=True)                    # (E, 1)
    a_r = jnp.sum(x * att_r, axis=-1, keepdims=True)                    # (N, 1)
    a_i = _gather_rows(gdst, a_r)                                       # (E, 1)
    alpha = _segment_softmax(_leaky_relu(a_j + a_i), gdst)              # (E, 1)
    msg = jnp.dot(h, w2_t, preferred_element_type=jnp.float32) * alpha  # (E, C)
    return _elu(_scatter_dot(gdst, msg) + bias)                         # (N, C)


def _gat_conv(x, gsrc, gdst, w_t, att_src, att_dst, bias):
    # Atom-level GATConv: xs == xd == x, so project once.
    x_p = jnp.dot(x, w_t, preferred_element_type=jnp.float32)           # (N, C)
    a_s = jnp.sum(x_p * att_src, axis=-1, keepdims=True)                # (N, 1)
    a_d = jnp.sum(x_p * att_dst, axis=-1, keepdims=True)                # (N, 1)
    a_s_e = _gather_rows(gsrc, a_s)                                     # (E, 1)
    a_d_e = _gather_rows(gdst, a_d)                                     # (E, 1)
    alpha = _segment_softmax(_leaky_relu(a_s_e + a_d_e), gdst)          # (E, 1)
    msg = _gather_rows(gsrc, x_p) * alpha                               # (E, C)
    return _elu(_scatter_dot(gdst, msg) + bias)                         # (N, C)


def _gru_relu(inp, hx, w_rz, b_rz, w_in, b_in, w_hn, b_hn):
    """torch.nn.GRUCell (gates r, z, n) + fused .relu_().

    r/z: one (2C, C) matmul each over concat([inp, hx]) (input+hidden fused
    along the contraction axis, lane-aligned output).  n: split projections
    because r gates only the hidden half.  Activations stay f32 (v5e EUP).
    """
    cat = jnp.concatenate([inp, hx], axis=-1)                           # (M, 2C)
    r = jax.nn.sigmoid(
        jnp.dot(cat, w_rz[0], preferred_element_type=jnp.float32) + b_rz[0])
    z = jax.nn.sigmoid(
        jnp.dot(cat, w_rz[1], preferred_element_type=jnp.float32) + b_rz[1])
    hn = jnp.dot(hx, w_hn, preferred_element_type=jnp.float32) + b_hn
    n = jnp.tanh(jnp.dot(inp, w_in, preferred_element_type=jnp.float32) + b_in + r * hn)
    return jnp.maximum((1.0 - z) * n + z * hx, 0.0)


# ---------------------------------------------------------------------------
# The single fused kernel
# ---------------------------------------------------------------------------
def _atom_embedding_kernel(*refs, num_layers, num_timesteps):
    it = iter(refs)
    x_ref, ea_ref, src_ref, dst_ref, batch_ref = (next(it) for _ in range(5))
    gate_refs = [next(it) for _ in range(6)]
    gru_refs = [[next(it) for _ in range(6)] for _ in range(num_layers)]
    gat_refs = [[next(it) for _ in range(4)] for _ in range(num_layers - 1)]
    mol_gat_refs = [next(it) for _ in range(4)]
    mol_gru_refs = [next(it) for _ in range(6)]
    out_ref = next(it)

    rd = lambda rs: [r[...] for r in rs]

    x = x_ref[...]                                       # (N, C)
    edge_attr = ea_ref[...]                              # (E, D)
    N = x_ref.shape[0]
    E = src_ref.shape[0]
    B = out_ref.shape[0]

    # Gather/scatter one-hots built on-core from int32 index columns
    # (only E*4 + E*4 + N*4 bytes of HBM DMA instead of O(E*N)).
    gsrc = _one_hot(src_ref[...], E, N)                  # (E, N)
    gdst = _one_hot(dst_ref[...], E, N)                  # (E, N)
    gdstm = _one_hot(batch_ref[...], N, B)               # (N, B) node->mol

    # layer 0: GATEConv (+elu) -> GRUCell (+relu)
    h = _gate_conv(x, edge_attr, gsrc, gdst, *rd(gate_refs))
    x = _gru_relu(h, x, *rd(gru_refs[0]))

    # layers 1..L-1: GATConv (+elu) -> GRUCell (+relu); x stays resident on-core.
    # TODO(synk): pack per-layer weights with a leading layer axis + fori_loop
    # (or a grid axis) to bound live ranges for large num_layers.
    for l in range(1, num_layers):
        h = _gat_conv(x, gsrc, gdst, *rd(gat_refs[l - 1]))
        x = _gru_relu(h, x, *rd(gru_refs[l]))

    # molecule readout: global_add_pool(x, batch).relu_()
    out = jnp.maximum(_scatter_dot(gdstm, x), 0.0)       # (B, C)

    # mol-level refinement: edge_index = [arange(N), batch] -> source one-hot
    # is the identity.  x-side projection/attention are loop-invariant: hoist.
    mg_w, mg_asrc, mg_adst, mg_bias = rd(mol_gat_refs)
    mol_gru = rd(mol_gru_refs)
    xs_p = jnp.dot(x, mg_w, preferred_element_type=jnp.float32)      # (N, C)
    a_s = jnp.sum(xs_p * mg_asrc, axis=-1, keepdims=True)            # (N, 1)

    def mol_step(_, out):
        xd_p = jnp.dot(out, mg_w, preferred_element_type=jnp.float32)    # (B, C)
        a_d = jnp.sum(xd_p * mg_adst, axis=-1, keepdims=True)            # (B, 1)
        a_d_e = _gather_rows(gdstm, a_d)                                 # (N, 1)
        alpha = _segment_softmax(_leaky_relu(a_s + a_d_e), gdstm)        # (N, 1)
        h = _elu(_scatter_dot(gdstm, xs_p * alpha) + mg_bias)            # (B, C)
        return _gru_relu(h, out, *mol_gru)

    out = lax.fori_loop(0, num_timesteps, mol_step, out)
    out_ref[...] = out


# ---------------------------------------------------------------------------
# Parameters (deterministic synthetic init; shapes from the module __init__)
# ---------------------------------------------------------------------------
def init_params(key, in_channels, edge_dim, num_layers):
    C, D = in_channels, edge_dim
    keys = iter(jax.random.split(key, 128))

    def nrm(shape, scale=0.2):
        return (scale * jax.random.normal(next(keys), shape)).astype(jnp.float32)

    def gru_p():
        # r/z: fused (input;hidden) weights stacked along contraction axis,
        # biases combined (b_ih + b_hh). n gate kept split (r gates hidden).
        return dict(w_rz=nrm((2, 2 * C, C)), b_rz=nrm((2, 1, C)),
                    w_in=nrm((C, C)), b_in=nrm((1, C)),
                    w_hn=nrm((C, C)), b_hn=nrm((1, C)))

    def gat_p():
        return dict(w_t=nrm((C, C)), att_src=nrm((1, C)), att_dst=nrm((1, C)),
                    bias=jnp.zeros((1, C), jnp.float32))

    return {
        'gate': dict(
            # lin1: Linear(C + D, C, bias=False); stored transposed & split
            w1x_t=nrm((C, C)), w1e_t=nrm((D, C)),
            # lin2: Linear(C, C, bias=False); stored transposed
            w2_t=nrm((C, C)),
            att_l=nrm((1, C)), att_r=nrm((1, C)),
            bias=jnp.zeros((1, C), jnp.float32),
        ),
        'grus': [gru_p() for _ in range(num_layers)],
        'gats': [gat_p() for _ in range(num_layers - 1)],
        'mol_gat': gat_p(),
        'mol_gru': gru_p(),
    }


# ---------------------------------------------------------------------------
# Full AtomEmbedding forward: one pallas_call, everything resident on-core
# ---------------------------------------------------------------------------
def atom_embedding_forward(params, x, edge_index, edge_attr, batch, num_mols,
                           num_layers, num_timesteps):
    N, C = x.shape
    src = edge_index[0].astype(jnp.int32).reshape(-1, 1)     # (E, 1)
    dst = edge_index[1].astype(jnp.int32).reshape(-1, 1)     # (E, 1)
    batch_col = batch.astype(jnp.int32).reshape(-1, 1)       # (N, 1)

    flat = [x, edge_attr, src, dst, batch_col]
    g = params['gate']
    flat += [g['w1x_t'], g['w1e_t'], g['w2_t'], g['att_l'], g['att_r'], g['bias']]
    for l in range(num_layers):
        gr = params['grus'][l]
        flat += [gr['w_rz'], gr['b_rz'], gr['w_in'], gr['b_in'], gr['w_hn'], gr['b_hn']]
    for l in range(num_layers - 1):
        ga = params['gats'][l]
        flat += [ga['w_t'], ga['att_src'], ga['att_dst'], ga['bias']]
    mg = params['mol_gat']
    flat += [mg['w_t'], mg['att_src'], mg['att_dst'], mg['bias']]
    mr = params['mol_gru']
    flat += [mr['w_rz'], mr['b_rz'], mr['w_in'], mr['b_in'], mr['w_hn'], mr['b_hn']]

    kernel = functools.partial(_atom_embedding_kernel,
                               num_layers=num_layers,
                               num_timesteps=num_timesteps)
    # TODO(synk): a per-molecule 'parallel' grid axis (graph is block-diagonal)
    # would engage v7x's 2nd TensorCore and bound per-step VMEM for big graphs.
    return pl.pallas_call(
        kernel,
        out_shape=jax.ShapeDtypeStruct((num_mols, C), jnp.float32),
        in_specs=[pl.BlockSpec(memory_space=pltpu.MemorySpace.VMEM)] * len(flat),
        out_specs=pl.BlockSpec(memory_space=pltpu.MemorySpace.VMEM),
        # <= v7x's 64 MiB physical per-TC VMEM; usage here is tiny anyway.
        compiler_params=pltpu.CompilerParams(vmem_limit_bytes=48 * 1024 * 1024),
    )(*flat)


if __name__ == "__main__":
    in_channels = 16
    edge_dim = 8
    num_layers = 2
    num_timesteps = 2

    N = 8          # atoms
    num_mols = 2   # molecules (batch size)

    key = jax.random.PRNGKey(0)
    k_param, k_x, k_e = jax.random.split(key, 3)

    params = init_params(k_param, in_channels, edge_dim, num_layers)

    x = jax.random.normal(k_x, (N, in_channels), dtype=jnp.float32)

    # two molecules of 4 atoms each, bidirectional chain edges inside each
    src = jnp.array([0, 1, 1, 2, 2, 3, 4, 5, 5, 6, 6, 7], dtype=jnp.int32)
    dst = jnp.array([1, 0, 2, 1, 3, 2, 5, 4, 6, 5, 7, 6], dtype=jnp.int32)
    edge_index = jnp.stack([src, dst], axis=0)                         # (2, E)
    edge_attr = jax.random.normal(k_e, (src.shape[0], edge_dim), dtype=jnp.float32)
    batch = jnp.array([0, 0, 0, 0, 1, 1, 1, 1], dtype=jnp.int32)       # (N,)

    out = atom_embedding_forward(params, x, edge_index, edge_attr, batch,
                                 num_mols, num_layers, num_timesteps)
    out = jax.block_until_ready(out)
    assert out.shape == (num_mols, in_channels)
    assert bool(jnp.all(jnp.isfinite(out)))
    print("KERNEL_OK")
</pallas_src>

<mosaic_0001>
module attributes {stable_mosaic.version = 11 : i64} {
  func.func @_atom_embedding_kernel(%arg0: memref<8x16xf32, #tpu.memory_space<vmem>>, %arg1: memref<12x8xf32, #tpu.memory_space<vmem>>, %arg2: memref<12x1xi32, #tpu.memory_space<vmem>>, %arg3: memref<12x1xi32, #tpu.memory_space<vmem>>, %arg4: memref<8x1xi32, #tpu.memory_space<vmem>>, %arg5: memref<16x16xf32, #tpu.memory_space<vmem>>, %arg6: memref<8x16xf32, #tpu.memory_space<vmem>>, %arg7: memref<16x16xf32, #tpu.memory_space<vmem>>, %arg8: memref<1x16xf32, #tpu.memory_space<vmem>>, %arg9: memref<1x16xf32, #tpu.memory_space<vmem>>, %arg10: memref<1x16xf32, #tpu.memory_space<vmem>>, %arg11: memref<2x32x16xf32, #tpu.memory_space<vmem>>, %arg12: memref<2x1x16xf32, #tpu.memory_space<vmem>>, %arg13: memref<16x16xf32, #tpu.memory_space<vmem>>, %arg14: memref<1x16xf32, #tpu.memory_space<vmem>>, %arg15: memref<16x16xf32, #tpu.memory_space<vmem>>, %arg16: memref<1x16xf32, #tpu.memory_space<vmem>>, %arg17: memref<2x32x16xf32, #tpu.memory_space<vmem>>, %arg18: memref<2x1x16xf32, #tpu.memory_space<vmem>>, %arg19: memref<16x16xf32, #tpu.memory_space<vmem>>, %arg20: memref<1x16xf32, #tpu.memory_space<vmem>>, %arg21: memref<16x16xf32, #tpu.memory_space<vmem>>, %arg22: memref<1x16xf32, #tpu.memory_space<vmem>>, %arg23: memref<16x16xf32, #tpu.memory_space<vmem>>, %arg24: memref<1x16xf32, #tpu.memory_space<vmem>>, %arg25: memref<1x16xf32, #tpu.memory_space<vmem>>, %arg26: memref<1x16xf32, #tpu.memory_space<vmem>>, %arg27: memref<16x16xf32, #tpu.memory_space<vmem>>, %arg28: memref<1x16xf32, #tpu.memory_space<vmem>>, %arg29: memref<1x16xf32, #tpu.memory_space<vmem>>, %arg30: memref<1x16xf32, #tpu.memory_space<vmem>>, %arg31: memref<2x32x16xf32, #tpu.memory_space<vmem>>, %arg32: memref<2x1x16xf32, #tpu.memory_space<vmem>>, %arg33: memref<16x16xf32, #tpu.memory_space<vmem>>, %arg34: memref<1x16xf32, #tpu.memory_space<vmem>>, %arg35: memref<16x16xf32, #tpu.memory_space<vmem>>, %arg36: memref<1x16xf32, #tpu.memory_space<vmem>>, %arg37: memref<2x16xf32, #tpu.memory_space<vmem>>) attributes {dimension_semantics = [], scalar_prefetch = 0 : i64, scratch_operands = 0 : i64, tpu.core_type = #tpu.core_type<tc>} {
    %c0 = arith.constant 0 : index
    %c0_0 = arith.constant 0 : index
    %0 = vector.load %arg0[%c0, %c0_0] : memref<8x16xf32, #tpu.memory_space<vmem>>, vector<8x16xf32>
    %c0_1 = arith.constant 0 : index
    %c0_2 = arith.constant 0 : index
    %1 = vector.load %arg1[%c0_1, %c0_2] : memref<12x8xf32, #tpu.memory_space<vmem>>, vector<12x8xf32>
    %c0_3 = arith.constant 0 : index
    %c0_4 = arith.constant 0 : index
    %2 = vector.load %arg2[%c0_3, %c0_4] : memref<12x1xi32, #tpu.memory_space<vmem>>, vector<12x1xi32>
    %3 = tpu.iota {dimensions = array<i32: 1>} : vector<12x8xi32>
    %4 = vector.broadcast %2 : vector<12x1xi32> to vector<12x8xi32>
    %5 = arith.cmpi eq, %3, %4 : vector<12x8xi32>
    %cst = arith.constant 1.000000e+00 : f32
    %cst_5 = arith.constant 0.000000e+00 : f32
    %6 = vector.broadcast %cst : f32 to vector<12x8xf32>
    %7 = vector.broadcast %cst_5 : f32 to vector<12x8xf32>
    %8 = arith.select %5, %6, %7 : vector<12x8xi1>, vector<12x8xf32>
    %c0_6 = arith.constant 0 : index
    %c0_7 = arith.constant 0 : index
    %9 = vector.load %arg3[%c0_6, %c0_7] : memref<12x1xi32, #tpu.memory_space<vmem>>, vector<12x1xi32>
    %10 = tpu.iota {dimensions = array<i32: 1>} : vector<12x8xi32>
    %11 = vector.broadcast %9 : vector<12x1xi32> to vector<12x8xi32>
    %12 = arith.cmpi eq, %10, %11 : vector<12x8xi32>
    %cst_8 = arith.constant 1.000000e+00 : f32
    %cst_9 = arith.constant 0.000000e+00 : f32
    %13 = vector.broadcast %cst_8 : f32 to vector<12x8xf32>
    %14 = vector.broadcast %cst_9 : f32 to vector<12x8xf32>
    %15 = arith.select %12, %13, %14 : vector<12x8xi1>, vector<12x8xf32>
    %c0_10 = arith.constant 0 : index
    %c0_11 = arith.constant 0 : index
    %16 = vector.load %arg4[%c0_10, %c0_11] : memref<8x1xi32, #tpu.memory_space<vmem>>, vector<8x1xi32>
    %17 = tpu.iota {dimensions = array<i32: 1>} : vector<8x2xi32>
    %18 = vector.broadcast %16 : vector<8x1xi32> to vector<8x2xi32>
    %19 = arith.cmpi eq, %17, %18 : vector<8x2xi32>
    %cst_12 = arith.constant 1.000000e+00 : f32
    %cst_13 = arith.constant 0.000000e+00 : f32
    %20 = vector.broadcast %cst_12 : f32 to vector<8x2xf32>
    %21 = vector.broadcast %cst_13 : f32 to vector<8x2xf32>
    %22 = arith.select %19, %20, %21 : vector<8x2xi1>, vector<8x2xf32>
    %c0_14 = arith.constant 0 : index
    %c0_15 = arith.constant 0 : index
    %23 = vector.load %arg5[%c0_14, %c0_15] : memref<16x16xf32, #tpu.memory_space<vmem>>, vector<16x16xf32>
    %c0_16 = arith.constant 0 : index
    %c0_17 = arith.constant 0 : index
    %24 = vector.load %arg6[%c0_16, %c0_17] : memref<8x16xf32, #tpu.memory_space<vmem>>, vector<8x16xf32>
    %c0_18 = arith.constant 0 : index
    %c0_19 = arith.constant 0 : index
    %25 = vector.load %arg7[%c0_18, %c0_19] : memref<16x16xf32, #tpu.memory_space<vmem>>, vector<16x16xf32>
    %c0_20 = arith.constant 0 : index
    %c0_21 = arith.constant 0 : index
    %26 = vector.load %arg8[%c0_20, %c0_21] : memref<1x16xf32, #tpu.memory_space<vmem>>, vector<1x16xf32>
    %c0_22 = arith.constant 0 : index
    %c0_23 = arith.constant 0 : index
    %27 = vector.load %arg9[%c0_22, %c0_23] : memref<1x16xf32, #tpu.memory_space<vmem>>, vector<1x16xf32>
    %c0_24 = arith.constant 0 : index
    %c0_25 = arith.constant 0 : index
    %28 = vector.load %arg10[%c0_24, %c0_25] : memref<1x16xf32, #tpu.memory_space<vmem>>, vector<1x16xf32>
    %cst_26 = arith.constant dense<0.000000e+00> : vector<8x16xf32>
    %29 = tpu.matmul %0, %23, %cst_26 {dimension_numbers = #tpu.dot_dimension_numbers<[1], [0], [0], [1], [0, 0, 1, 1], [], []>} : vector<8x16xf32>, vector<16x16xf32>, vector<8x16xf32> -> vector<8x16xf32>
    %cst_27 = arith.constant dense<0.000000e+00> : vector<12x16xf32>
    %30 = tpu.matmul %8, %29, %cst_27 {dimension_numbers = #tpu.dot_dimension_numbers<[1], [0], [0], [1], [0, 0, 1, 1], [], []>} : vector<12x8xf32>, vector<8x16xf32>, vector<12x16xf32> -> vector<12x16xf32>
    %cst_28 = arith.constant dense<0.000000e+00> : vector<12x16xf32>
    %31 = tpu.matmul %1, %24, %cst_28 {dimension_numbers = #tpu.dot_dimension_numbers<[1], [0], [0], [1], [0, 0, 1, 1], [], []>} : vector<12x8xf32>, vector<8x16xf32>, vector<12x16xf32> -> vector<12x16xf32>
    %32 = arith.addf %30, %31 : vector<12x16xf32>
    %cst_29 = arith.constant 0.000000e+00 : f32
    %33 = vector.broadcast %cst_29 : f32 to vector<12x16xf32>
    %34 = arith.cmpf ogt, %32, %33 : vector<12x16xf32>
    %cst_30 = arith.constant 0.00999999977 : f32
    %35 = vector.broadcast %cst_30 : f32 to vector<12x16xf32>
    %36 = arith.mulf %35, %32 : vector<12x16xf32>
    %37 = arith.select %34, %32, %36 : vector<12x16xi1>, vector<12x16xf32>
    %38 = vector.broadcast %26 : vector<1x16xf32> to vector<12x16xf32>
    %39 = arith.mulf %37, %38 : vector<12x16xf32>
    %cst_31 = arith.constant dense<0.000000e+00> : vector<12xf32>
    %40 = vector.multi_reduction <add>, %39, %cst_31 [1] : vector<12x16xf32> to vector<12xf32>
    %41 = vector.shape_cast %40 : vector<12xf32> to vector<12x1xf32>
    %42 = vector.broadcast %27 : vector<1x16xf32> to vector<8x16xf32>
    %43 = arith.mulf %0, %42 : vector<8x16xf32>
    %cst_32 = arith.constant dense<0.000000e+00> : vector<8xf32>
    %44 = vector.multi_reduction <add>, %43, %cst_32 [1] : vector<8x16xf32> to vector<8xf32>
    %45 = vector.shape_cast %44 : vector<8xf32> to vector<8x1xf32>
    %cst_33 = arith.constant dense<0.000000e+00> : vector<12x1xf32>
    %46 = tpu.matmul %15, %45, %cst_33 {dimension_numbers = #tpu.dot_dimension_numbers<[1], [0], [0], [1], [0, 0, 1, 1], [], []>} : vector<12x8xf32>, vector<8x1xf32>, vector<12x1xf32> -> vector<12x1xf32>
    %47 = arith.addf %41, %46 : vector<12x1xf32>
    %cst_34 = arith.constant 0.000000e+00 : f32
    %48 = vector.broadcast %cst_34 : f32 to vector<12x1xf32>
    %49 = arith.cmpf ogt, %47, %48 : vector<12x1xf32>
    %cst_35 = arith.constant 0.00999999977 : f32
    %50 = vector.broadcast %cst_35 : f32 to vector<12x1xf32>
    %51 = arith.mulf %50, %47 : vector<12x1xf32>
    %52 = arith.select %49, %47, %51 : vector<12x1xi1>, vector<12x1xf32>
    %cst_36 = arith.constant 1.000000e+00 : f32
    %53 = vector.broadcast %cst_36 : f32 to vector<12x8xf32>
    %54 = arith.subf %15, %53 : vector<12x8xf32>
    %cst_37 = arith.constant 1.000000e+30 : f32
    %55 = vector.broadcast %cst_37 : f32 to vector<12x8xf32>
    %56 = arith.mulf %54, %55 : vector<12x8xf32>
    %57 = vector.broadcast %52 : vector<12x1xf32> to vector<12x8xf32>
    %58 = arith.addf %57, %56 : vector<12x8xf32>
    %cst_38 = arith.constant dense<0xFF800000> : vector<8xf32>
    %59 = vector.multi_reduction <maximumf>, %58, %cst_38 [0] : vector<12x8xf32> to vector<8xf32>
    %60 = vector.shape_cast %59 : vector<8xf32> to vector<1x8xf32>
    %cst_39 = arith.constant dense<0.000000e+00> : vector<12x1xf32>
    %61 = tpu.matmul %15, %60, %cst_39 {dimension_numbers = #tpu.dot_dimension_numbers<[1], [1], [0], [0], [0, 0, 1, 0], [], []>} : vector<12x8xf32>, vector<1x8xf32>, vector<12x1xf32> -> vector<12x1xf32>
    %62 = arith.subf %52, %61 : vector<12x1xf32>
    %63 = math.exp %62 : vector<12x1xf32>
    %cst_40 = arith.constant dense<0.000000e+00> : vector<8x1xf32>
    %64 = tpu.matmul %15, %63, %cst_40 {dimension_numbers = #tpu.dot_dimension_numbers<[0], [0], [1], [1], [0, 1, 1, 1], [], []>} : vector<12x8xf32>, vector<12x1xf32>, vector<8x1xf32> -> vector<8x1xf32>
    %cst_41 = arith.constant dense<0.000000e+00> : vector<12x1xf32>
    %65 = tpu.matmul %15, %64, %cst_41 {dimension_numbers = #tpu.dot_dimension_numbers<[1], [0], [0], [1], [0, 0, 1, 1], [], []>} : vector<12x8xf32>, vector<8x1xf32>, vector<12x1xf32> -> vector<12x1xf32>
    %66 = tpu.reciprocal %65 {approx = true} : vector<12x1xf32> -> vector<12x1xf32>
    %67 = arith.mulf %63, %66 : vector<12x1xf32>
    %cst_42 = arith.constant dense<0.000000e+00> : vector<12x16xf32>
    %68 = tpu.matmul %37, %25, %cst_42 {dimension_numbers = #tpu.dot_dimension_numbers<[1], [0], [0], [1], [0, 0, 1, 1], [], []>} : vector<12x16xf32>, vector<16x16xf32>, vector<12x16xf32> -> vector<12x16xf32>
    %69 = vector.broadcast %67 : vector<12x1xf32> to vector<12x16xf32>
    %70 = arith.mulf %68, %69 : vector<12x16xf32>
    %cst_43 = arith.constant dense<0.000000e+00> : vector<8x16xf32>
    %71 = tpu.matmul %15, %70, %cst_43 {dimension_numbers = #tpu.dot_dimension_numbers<[0], [0], [1], [1], [0, 1, 1, 1], [], []>} : vector<12x8xf32>, vector<12x16xf32>, vector<8x16xf32> -> vector<8x16xf32>
    %72 = vector.broadcast %28 : vector<1x16xf32> to vector<8x16xf32>
    %73 = arith.addf %71, %72 : vector<8x16xf32>
    %cst_44 = arith.constant 0.000000e+00 : f32
    %74 = vector.broadcast %cst_44 : f32 to vector<8x16xf32>
    %75 = arith.cmpf ogt, %73, %74 : vector<8x16xf32>
    %76 = math.exp %73 : vector<8x16xf32>
    %cst_45 = arith.constant 1.000000e+00 : f32
    %77 = vector.broadcast %cst_45 : f32 to vector<8x16xf32>
    %78 = arith.subf %76, %77 : vector<8x16xf32>
    %79 = arith.select %75, %73, %78 : vector<8x16xi1>, vector<8x16xf32>
    %c0_46 = arith.constant 0 : index
    %c0_47 = arith.constant 0 : index
    %c0_48 = arith.constant 0 : index
    %80 = vector.load %arg11[%c0_46, %c0_47, %c0_48] : memref<2x32x16xf32, #tpu.memory_space<vmem>>, vector<2x32x16xf32>
    %c0_49 = arith.constant 0 : index
    %c0_50 = arith.constant 0 : index
    %c0_51 = arith.constant 0 : index
    %81 = vector.load %arg12[%c0_49, %c0_50, %c0_51] : memref<2x1x16xf32, #tpu.memory_space<vmem>>, vector<2x1x16xf32>
    %c0_52 = arith.constant 0 : index
    %c0_53 = arith.constant 0 : index
    %82 = vector.load %arg13[%c0_52, %c0_53] : memref<16x16xf32, #tpu.memory_space<vmem>>, vector<16x16xf32>
    %c0_54 = arith.constant 0 : index
    %c0_55 = arith.constant 0 : index
    %83 = vector.load %arg14[%c0_54, %c0_55] : memref<1x16xf32, #tpu.memory_space<vmem>>, vector<1x16xf32>
    %c0_56 = arith.constant 0 : index
    %c0_57 = arith.constant 0 : index
    %84 = vector.load %arg15[%c0_56, %c0_57] : memref<16x16xf32, #tpu.memory_space<vmem>>, vector<16x16xf32>
    %c0_58 = arith.constant 0 : index
    %c0_59 = arith.constant 0 : index
    %85 = vector.load %arg16[%c0_58, %c0_59] : memref<1x16xf32, #tpu.memory_space<vmem>>, vector<1x16xf32>
    %86 = tpu.concatenate %79, %0 in 1 : vector<8x16xf32>, vector<8x16xf32> -> vector<8x32xf32>
    %87 = vector.extract_strided_slice %80 {offsets = [0, 0, 0], sizes = [1, 32, 16], strides = [1, 1, 1]} : vector<2x32x16xf32> to vector<1x32x16xf32>
    %88 = vector.shape_cast %87 : vector<1x32x16xf32> to vector<32x16xf32>
    %cst_60 = arith.constant dense<0.000000e+00> : vector<8x16xf32>
    %89 = tpu.matmul %86, %88, %cst_60 {dimension_numbers = #tpu.dot_dimension_numbers<[1], [0], [0], [1], [0, 0, 1, 1], [], []>} : vector<8x32xf32>, vector<32x16xf32>, vector<8x16xf32> -> vector<8x16xf32>
    %90 = vector.extract_strided_slice %81 {offsets = [0, 0, 0], sizes = [1, 1, 16], strides = [1, 1, 1]} : vector<2x1x16xf32> to vector<1x1x16xf32>
    %91 = vector.shape_cast %90 : vector<1x1x16xf32> to vector<1x16xf32>
    %92 = vector.broadcast %91 : vector<1x16xf32> to vector<8x16xf32>
    %93 = arith.addf %89, %92 : vector<8x16xf32>
    %94 = arith.negf %93 : vector<8x16xf32>
    %95 = math.exp %94 : vector<8x16xf32>
    %cst_61 = arith.constant 1.000000e+00 : f32
    %96 = vector.broadcast %cst_61 : f32 to vector<8x16xf32>
    %97 = arith.addf %96, %95 : vector<8x16xf32>
    %98 = arith.divf %96, %97 : vector<8x16xf32>
    %99 = vector.extract_strided_slice %80 {offsets = [1, 0, 0], sizes = [1, 32, 16], strides = [1, 1, 1]} : vector<2x32x16xf32> to vector<1x32x16xf32>
    %100 = vector.shape_cast %99 : vector<1x32x16xf32> to vector<32x16xf32>
    %cst_62 = arith.constant dense<0.000000e+00> : vector<8x16xf32>
    %101 = tpu.matmul %86, %100, %cst_62 {dimension_numbers = #tpu.dot_dimension_numbers<[1], [0], [0], [1], [0, 0, 1, 1], [], []>} : vector<8x32xf32>, vector<32x16xf32>, vector<8x16xf32> -> vector<8x16xf32>
    %102 = vector.extract_strided_slice %81 {offsets = [1, 0, 0], sizes = [1, 1, 16], strides = [1, 1, 1]} : vector<2x1x16xf32> to vector<1x1x16xf32>
    %103 = vector.shape_cast %102 : vector<1x1x16xf32> to vector<1x16xf32>
    %104 = vector.broadcast %103 : vector<1x16xf32> to vector<8x16xf32>
    %105 = arith.addf %101, %104 : vector<8x16xf32>
    %106 = arith.negf %105 : vector<8x16xf32>
    %107 = math.exp %106 : vector<8x16xf32>
    %cst_63 = arith.constant 1.000000e+00 : f32
    %108 = vector.broadcast %cst_63 : f32 to vector<8x16xf32>
    %109 = arith.addf %108, %107 : vector<8x16xf32>
    %110 = arith.divf %108, %109 : vector<8x16xf32>
    %cst_64 = arith.constant dense<0.000000e+00> : vector<8x16xf32>
    %111 = tpu.matmul %0, %84, %cst_64 {dimension_numbers = #tpu.dot_dimension_numbers<[1], [0], [0], [1], [0, 0, 1, 1], [], []>} : vector<8x16xf32>, vector<16x16xf32>, vector<8x16xf32> -> vector<8x16xf32>
    %112 = vector.broadcast %85 : vector<1x16xf32> to vector<8x16xf32>
    %113 = arith.addf %111, %112 : vector<8x16xf32>
    %cst_65 = arith.constant dense<0.000000e+00> : vector<8x16xf32>
    %114 = tpu.matmul %79, %82, %cst_65 {dimension_numbers = #tpu.dot_dimension_numbers<[1], [0], [0], [1], [0, 0, 1, 1], [], []>} : vector<8x16xf32>, vector<16x16xf32>, vector<8x16xf32> -> vector<8x16xf32>
    %115 = vector.broadcast %83 : vector<1x16xf32> to vector<8x16xf32>
    %116 = arith.addf %114, %115 : vector<8x16xf32>
    %117 = arith.mulf %98, %113 : vector<8x16xf32>
    %118 = arith.addf %116, %117 : vector<8x16xf32>
    %119 = math.tanh %118 : vector<8x16xf32>
    %cst_66 = arith.constant 1.000000e+00 : f32
    %120 = vector.broadcast %cst_66 : f32 to vector<8x16xf32>
    %121 = arith.subf %120, %110 : vector<8x16xf32>
    %122 = arith.mulf %121, %119 : vector<8x16xf32>
    %123 = arith.mulf %110, %0 : vector<8x16xf32>
    %124 = arith.addf %122, %123 : vector<8x16xf32>
    %cst_67 = arith.constant 0.000000e+00 : f32
    %125 = vector.broadcast %cst_67 : f32 to vector<8x16xf32>
    %126 = arith.maximumf %124, %125 : vector<8x16xf32>
    %c0_68 = arith.constant 0 : index
    %c0_69 = arith.constant 0 : index
    %127 = vector.load %arg23[%c0_68, %c0_69] : memref<16x16xf32, #tpu.memory_space<vmem>>, vector<16x16xf32>
    %c0_70 = arith.constant 0 : index
    %c0_71 = arith.constant 0 : index
    %128 = vector.load %arg24[%c0_70, %c0_71] : memref<1x16xf32, #tpu.memory_space<vmem>>, vector<1x16xf32>
    %c0_72 = arith.constant 0 : index
    %c0_73 = arith.constant 0 : index
    %129 = vector.load %arg25[%c0_72, %c0_73] : memref<1x16xf32, #tpu.memory_space<vmem>>, vector<1x16xf32>
    %c0_74 = arith.constant 0 : index
    %c0_75 = arith.constant 0 : index
    %130 = vector.load %arg26[%c0_74, %c0_75] : memref<1x16xf32, #tpu.memory_space<vmem>>, vector<1x16xf32>
    %cst_76 = arith.constant dense<0.000000e+00> : vector<8x16xf32>
    %131 = tpu.matmul %126, %127, %cst_76 {dimension_numbers = #tpu.dot_dimension_numbers<[1], [0], [0], [1], [0, 0, 1, 1], [], []>} : vector<8x16xf32>, vector<16x16xf32>, vector<8x16xf32> -> vector<8x16xf32>
    %132 = vector.broadcast %128 : vector<1x16xf32> to vector<8x16xf32>
    %133 = arith.mulf %131, %132 : vector<8x16xf32>
    %cst_77 = arith.constant dense<0.000000e+00> : vector<8xf32>
    %134 = vector.multi_reduction <add>, %133, %cst_77 [1] : vector<8x16xf32> to vector<8xf32>
    %135 = vector.shape_cast %134 : vector<8xf32> to vector<8x1xf32>
    %136 = vector.broadcast %129 : vector<1x16xf32> to vector<8x16xf32>
    %137 = arith.mulf %131, %136 : vector<8x16xf32>
    %cst_78 = arith.constant dense<0.000000e+00> : vector<8xf32>
    %138 = vector.multi_reduction <add>, %137, %cst_78 [1] : vector<8x16xf32> to vector<8xf32>
    %139 = vector.shape_cast %138 : vector<8xf32> to vector<8x1xf32>
    %cst_79 = arith.constant dense<0.000000e+00> : vector<12x1xf32>
    %140 = tpu.matmul %8, %135, %cst_79 {dimension_numbers = #tpu.dot_dimension_numbers<[1], [0], [0], [1], [0, 0, 1, 1], [], []>} : vector<12x8xf32>, vector<8x1xf32>, vector<12x1xf32> -> vector<12x1xf32>
    %cst_80 = arith.constant dense<0.000000e+00> : vector<12x1xf32>
    %141 = tpu.matmul %15, %139, %cst_80 {dimension_numbers = #tpu.dot_dimension_numbers<[1], [0], [0], [1], [0, 0, 1, 1], [], []>} : vector<12x8xf32>, vector<8x1xf32>, vector<12x1xf32> -> vector<12x1xf32>
    %142 = arith.addf %140, %141 : vector<12x1xf32>
    %cst_81 = arith.constant 0.000000e+00 : f32
    %143 = vector.broadcast %cst_81 : f32 to vector<12x1xf32>
    %144 = arith.cmpf ogt, %142, %143 : vector<12x1xf32>
    %cst_82 = arith.constant 0.00999999977 : f32
    %145 = vector.broadcast %cst_82 : f32 to vector<12x1xf32>
    %146 = arith.mulf %145, %142 : vector<12x1xf32>
    %147 = arith.select %144, %142, %146 : vector<12x1xi1>, vector<12x1xf32>
    %cst_83 = arith.constant 1.000000e+00 : f32
    %148 = vector.broadcast %cst_83 : f32 to vector<12x8xf32>
    %149 = arith.subf %15, %148 : vector<12x8xf32>
    %cst_84 = arith.constant 1.000000e+30 : f32
    %150 = vector.broadcast %cst_84 : f32 to vector<12x8xf32>
    %151 = arith.mulf %149, %150 : vector<12x8xf32>
    %152 = vector.broadcast %147 : vector<12x1xf32> to vector<12x8xf32>
    %153 = arith.addf %152, %151 : vector<12x8xf32>
    %cst_85 = arith.constant dense<0xFF800000> : vector<8xf32>
    %154 = vector.multi_reduction <maximumf>, %153, %cst_85 [0] : vector<12x8xf32> to vector<8xf32>
    %155 = vector.shape_cast %154 : vector<8xf32> to vector<1x8xf32>
    %cst_86 = arith.constant dense<0.000000e+00> : vector<12x1xf32>
    %156 = tpu.matmul %15, %155, %cst_86 {dimension_numbers = #tpu.dot_dimension_numbers<[1], [1], [0], [0], [0, 0, 1, 0], [], []>} : vector<12x8xf32>, vector<1x8xf32>, vector<12x1xf32> -> vector<12x1xf32>
    %157 = arith.subf %147, %156 : vector<12x1xf32>
    %158 = math.exp %157 : vector<12x1xf32>
    %cst_87 = arith.constant dense<0.000000e+00> : vector<8x1xf32>
    %159 = tpu.matmul %15, %158, %cst_87 {dimension_numbers = #tpu.dot_dimension_numbers<[0], [0], [1], [1], [0, 1, 1, 1], [], []>} : vector<12x8xf32>, vector<12x1xf32>, vector<8x1xf32> -> vector<8x1xf32>
    %cst_88 = arith.constant dense<0.000000e+00> : vector<12x1xf32>
    %160 = tpu.matmul %15, %159, %cst_88 {dimension_numbers = #tpu.dot_dimension_numbers<[1], [0], [0], [1], [0, 0, 1, 1], [], []>} : vector<12x8xf32>, vector<8x1xf32>, vector<12x1xf32> -> vector<12x1xf32>
    %161 = tpu.reciprocal %160 {approx = true} : vector<12x1xf32> -> vector<12x1xf32>
    %162 = arith.mulf %158, %161 : vector<12x1xf32>
    %cst_89 = arith.constant dense<0.000000e+00> : vector<12x16xf32>
    %163 = tpu.matmul %8, %131, %cst_89 {dimension_numbers = #tpu.dot_dimension_numbers<[1], [0], [0], [1], [0, 0, 1, 1], [], []>} : vector<12x8xf32>, vector<8x16xf32>, vector<12x16xf32> -> vector<12x16xf32>
    %164 = vector.broadcast %162 : vector<12x1xf32> to vector<12x16xf32>
    %165 = arith.mulf %163, %164 : vector<12x16xf32>
    %cst_90 = arith.constant dense<0.000000e+00> : vector<8x16xf32>
    %166 = tpu.matmul %15, %165, %cst_90 {dimension_numbers = #tpu.dot_dimension_numbers<[0], [0], [1], [1], [0, 1, 1, 1], [], []>} : vector<12x8xf32>, vector<12x16xf32>, vector<8x16xf32> -> vector<8x16xf32>
    %167 = vector.broadcast %130 : vector<1x16xf32> to vector<8x16xf32>
    %168 = arith.addf %166, %167 : vector<8x16xf32>
    %cst_91 = arith.constant 0.000000e+00 : f32
    %169 = vector.broadcast %cst_91 : f32 to vector<8x16xf32>
    %170 = arith.cmpf ogt, %168, %169 : vector<8x16xf32>
    %171 = math.exp %168 : vector<8x16xf32>
    %cst_92 = arith.constant 1.000000e+00 : f32
    %172 = vector.broadcast %cst_92 : f32 to vector<8x16xf32>
    %173 = arith.subf %171, %172 : vector<8x16xf32>
    %174 = arith.select %170, %168, %173 : vector<8x16xi1>, vector<8x16xf32>
    %c0_93 = arith.constant 0 : index
    %c0_94 = arith.constant 0 : index
    %c0_95 = arith.constant 0 : index
    %175 = vector.load %arg17[%c0_93, %c0_94, %c0_95] : memref<2x32x16xf32, #tpu.memory_space<vmem>>, vector<2x32x16xf32>
    %c0_96 = arith.constant 0 : index
    %c0_97 = arith.constant 0 : index
    %c0_98 = arith.constant 0 : index
    %176 = vector.load %arg18[%c0_96, %c0_97, %c0_98] : memref<2x1x16xf32, #tpu.memory_space<vmem>>, vector<2x1x16xf32>
    %c0_99 = arith.constant 0 : index
    %c0_100 = arith.constant 0 : index
    %177 = vector.load %arg19[%c0_99, %c0_100] : memref<16x16xf32, #tpu.memory_space<vmem>>, vector<16x16xf32>
    %c0_101 = arith.constant 0 : index
    %c0_102 = arith.constant 0 : index
    %178 = vector.load %arg20[%c0_101, %c0_102] : memref<1x16xf32, #tpu.memory_space<vmem>>, vector<1x16xf32>
    %c0_103 = arith.constant 0 : index
    %c0_104 = arith.constant 0 : index
    %179 = vector.load %arg21[%c0_103, %c0_104] : memref<16x16xf32, #tpu.memory_space<vmem>>, vector<16x16xf32>
    %c0_105 = arith.constant 0 : index
    %c0_106 = arith.constant 0 : index
    %180 = vector.load %arg22[%c0_105, %c0_106] : memref<1x16xf32, #tpu.memory_space<vmem>>, vector<1x16xf32>
    %181 = tpu.concatenate %174, %126 in 1 : vector<8x16xf32>, vector<8x16xf32> -> vector<8x32xf32>
    %182 = vector.extract_strided_slice %175 {offsets = [0, 0, 0], sizes = [1, 32, 16], strides = [1, 1, 1]} : vector<2x32x16xf32> to vector<1x32x16xf32>
    %183 = vector.shape_cast %182 : vector<1x32x16xf32> to vector<32x16xf32>
    %cst_107 = arith.constant dense<0.000000e+00> : vector<8x16xf32>
    %184 = tpu.matmul %181, %183, %cst_107 {dimension_numbers = #tpu.dot_dimension_numbers<[1], [0], [0], [1], [0, 0, 1, 1], [], []>} : vector<8x32xf32>, vector<32x16xf32>, vector<8x16xf32> -> vector<8x16xf32>
    %185 = vector.extract_strided_slice %176 {offsets = [0, 0, 0], sizes = [1, 1, 16], strides = [1, 1, 1]} : vector<2x1x16xf32> to vector<1x1x16xf32>
    %186 = vector.shape_cast %185 : vector<1x1x16xf32> to vector<1x16xf32>
    %187 = vector.broadcast %186 : vector<1x16xf32> to vector<8x16xf32>
    %188 = arith.addf %184, %187 : vector<8x16xf32>
    %189 = arith.negf %188 : vector<8x16xf32>
    %190 = math.exp %189 : vector<8x16xf32>
    %cst_108 = arith.constant 1.000000e+00 : f32
    %191 = vector.broadcast %cst_108 : f32 to vector<8x16xf32>
    %192 = arith.addf %191, %190 : vector<8x16xf32>
    %193 = arith.divf %191, %192 : vector<8x16xf32>
    %194 = vector.extract_strided_slice %175 {offsets = [1, 0, 0], sizes = [1, 32, 16], strides = [1, 1, 1]} : vector<2x32x16xf32> to vector<1x32x16xf32>
    %195 = vector.shape_cast %194 : vector<1x32x16xf32> to vector<32x16xf32>
    %cst_109 = arith.constant dense<0.000000e+00> : vector<8x16xf32>
    %196 = tpu.matmul %181, %195, %cst_109 {dimension_numbers = #tpu.dot_dimension_numbers<[1], [0], [0], [1], [0, 0, 1, 1], [], []>} : vector<8x32xf32>, vector<32x16xf32>, vector<8x16xf32> -> vector<8x16xf32>
    %197 = vector.extract_strided_slice %176 {offsets = [1, 0, 0], sizes = [1, 1, 16], strides = [1, 1, 1]} : vector<2x1x16xf32> to vector<1x1x16xf32>
    %198 = vector.shape_cast %197 : vector<1x1x16xf32> to vector<1x16xf32>
    %199 = vector.broadcast %198 : vector<1x16xf32> to vector<8x16xf32>
    %200 = arith.addf %196, %199 : vector<8x16xf32>
    %201 = arith.negf %200 : vector<8x16xf32>
    %202 = math.exp %201 : vector<8x16xf32>
    %cst_110 = arith.constant 1.000000e+00 : f32
    %203 = vector.broadcast %cst_110 : f32 to vector<8x16xf32>
    %204 = arith.addf %203, %202 : vector<8x16xf32>
    %205 = arith.divf %203, %204 : vector<8x16xf32>
    %cst_111 = arith.constant dense<0.000000e+00> : vector<8x16xf32>
    %206 = tpu.matmul %126, %179, %cst_111 {dimension_numbers = #tpu.dot_dimension_numbers<[1], [0], [0], [1], [0, 0, 1, 1], [], []>} : vector<8x16xf32>, vector<16x16xf32>, vector<8x16xf32> -> vector<8x16xf32>
    %207 = vector.broadcast %180 : vector<1x16xf32> to vector<8x16xf32>
    %208 = arith.addf %206, %207 : vector<8x16xf32>
    %cst_112 = arith.constant dense<0.000000e+00> : vector<8x16xf32>
    %209 = tpu.matmul %174, %177, %cst_112 {dimension_numbers = #tpu.dot_dimension_numbers<[1], [0], [0], [1], [0, 0, 1, 1], [], []>} : vector<8x16xf32>, vector<16x16xf32>, vector<8x16xf32> -> vector<8x16xf32>
    %210 = vector.broadcast %178 : vector<1x16xf32> to vector<8x16xf32>
    %211 = arith.addf %209, %210 : vector<8x16xf32>
    %212 = arith.mulf %193, %208 : vector<8x16xf32>
    %213 = arith.addf %211, %212 : vector<8x16xf32>
    %214 = math.tanh %213 : vector<8x16xf32>
    %cst_113 = arith.constant 1.000000e+00 : f32
    %215 = vector.broadcast %cst_113 : f32 to vector<8x16xf32>
    %216 = arith.subf %215, %205 : vector<8x16xf32>
    %217 = arith.mulf %216, %214 : vector<8x16xf32>
    %218 = arith.mulf %205, %126 : vector<8x16xf32>
    %219 = arith.addf %217, %218 : vector<8x16xf32>
    %cst_114 = arith.constant 0.000000e+00 : f32
    %220 = vector.broadcast %cst_114 : f32 to vector<8x16xf32>
    %221 = arith.maximumf %219, %220 : vector<8x16xf32>
    %cst_115 = arith.constant dense<0.000000e+00> : vector<2x16xf32>
    %222 = tpu.matmul %22, %221, %cst_115 {dimension_numbers = #tpu.dot_dimension_numbers<[0], [0], [1], [1], [0, 1, 1, 1], [], []>} : vector<8x2xf32>, vector<8x16xf32>, vector<2x16xf32> -> vector<2x16xf32>
    %cst_116 = arith.constant 0.000000e+00 : f32
    %223 = vector.broadcast %cst_116 : f32 to vector<2x16xf32>
    %224 = arith.maximumf %222, %223 : vector<2x16xf32>
    %c0_117 = arith.constant 0 : index
    %c0_118 = arith.constant 0 : index
    %225 = vector.load %arg27[%c0_117, %c0_118] : memref<16x16xf32, #tpu.memory_space<vmem>>, vector<16x16xf32>
    %c0_119 = arith.constant 0 : index
    %c0_120 = arith.constant 0 : index
    %226 = vector.load %arg28[%c0_119, %c0_120] : memref<1x16xf32, #tpu.memory_space<vmem>>, vector<1x16xf32>
    %c0_121 = arith.constant 0 : index
    %c0_122 = arith.constant 0 : index
    %227 = vector.load %arg29[%c0_121, %c0_122] : memref<1x16xf32, #tpu.memory_space<vmem>>, vector<1x16xf32>
    %c0_123 = arith.constant 0 : index
    %c0_124 = arith.constant 0 : index
    %228 = vector.load %arg30[%c0_123, %c0_124] : memref<1x16xf32, #tpu.memory_space<vmem>>, vector<1x16xf32>
    %c0_125 = arith.constant 0 : index
    %c0_126 = arith.constant 0 : index
    %c0_127 = arith.constant 0 : index
    %229 = vector.load %arg31[%c0_125, %c0_126, %c0_127] : memref<2x32x16xf32, #tpu.memory_space<vmem>>, vector<2x32x16xf32>
    %c0_128 = arith.constant 0 : index
    %c0_129 = arith.constant 0 : index
    %c0_130 = arith.constant 0 : index
    %230 = vector.load %arg32[%c0_128, %c0_129, %c0_130] : memref<2x1x16xf32, #tpu.memory_space<vmem>>, vector<2x1x16xf32>
    %c0_131 = arith.constant 0 : index
    %c0_132 = arith.constant 0 : index
    %231 = vector.load %arg33[%c0_131, %c0_132] : memref<16x16xf32, #tpu.memory_space<vmem>>, vector<16x16xf32>
    %c0_133 = arith.constant 0 : index
    %c0_134 = arith.constant 0 : index
    %232 = vector.load %arg34[%c0_133, %c0_134] : memref<1x16xf32, #tpu.memory_space<vmem>>, vector<1x16xf32>
    %c0_135 = arith.constant 0 : index
    %c0_136 = arith.constant 0 : index
    %233 = vector.load %arg35[%c0_135, %c0_136] : memref<16x16xf32, #tpu.memory_space<vmem>>, vector<16x16xf32>
    %c0_137 = arith.constant 0 : index
    %c0_138 = arith.constant 0 : index
    %234 = vector.load %arg36[%c0_137, %c0_138] : memref<1x16xf32, #tpu.memory_space<vmem>>, vector<1x16xf32>
    %cst_139 = arith.constant dense<0.000000e+00> : vector<8x16xf32>
    %235 = tpu.matmul %221, %225, %cst_139 {dimension_numbers = #tpu.dot_dimension_numbers<[1], [0], [0], [1], [0, 0, 1, 1], [], []>} : vector<8x16xf32>, vector<16x16xf32>, vector<8x16xf32> -> vector<8x16xf32>
    %236 = vector.broadcast %226 : vector<1x16xf32> to vector<8x16xf32>
    %237 = arith.mulf %235, %236 : vector<8x16xf32>
    %cst_140 = arith.constant dense<0.000000e+00> : vector<8xf32>
    %238 = vector.multi_reduction <add>, %237, %cst_140 [1] : vector<8x16xf32> to vector<8xf32>
    %239 = vector.shape_cast %238 : vector<8xf32> to vector<8x1xf32>
    %c0_i32 = arith.constant 0 : i32
    %c2_i32 = arith.constant 2 : i32
    %240 = arith.addi %c0_i32, %c2_i32 : i32
    %c1_i32 = arith.constant 1 : i32
    %241 = scf.for %arg38 = %c0_i32 to %240 step %c1_i32 iter_args(%arg39 = %224) -> (vector<2x16xf32>)  : i32 {
      %cst_143 = arith.constant dense<0.000000e+00> : vector<2x16xf32>
      %243 = tpu.matmul %arg39, %225, %cst_143 {dimension_numbers = #tpu.dot_dimension_numbers<[1], [0], [0], [1], [0, 0, 1, 1], [], []>} : vector<2x16xf32>, vector<16x16xf32>, vector<2x16xf32> -> vector<2x16xf32>
      %244 = vector.broadcast %227 : vector<1x16xf32> to vector<2x16xf32>
      %245 = arith.mulf %243, %244 : vector<2x16xf32>
      %cst_144 = arith.constant dense<0.000000e+00> : vector<2xf32>
      %246 = vector.multi_reduction <add>, %245, %cst_144 [1] : vector<2x16xf32> to vector<2xf32>
      %247 = vector.shape_cast %246 : vector<2xf32> to vector<2x1xf32>
      %cst_145 = arith.constant dense<0.000000e+00> : vector<8x1xf32>
      %248 = tpu.matmul %22, %247, %cst_145 {dimension_numbers = #tpu.dot_dimension_numbers<[1], [0], [0], [1], [0, 0, 1, 1], [], []>} : vector<8x2xf32>, vector<2x1xf32>, vector<8x1xf32> -> vector<8x1xf32>
      %249 = arith.addf %239, %248 : vector<8x1xf32>
      %cst_146 = arith.constant 0.000000e+00 : f32
      %250 = vector.broadcast %cst_146 : f32 to vector<8x1xf32>
      %251 = arith.cmpf ogt, %249, %250 : vector<8x1xf32>
      %cst_147 = arith.constant 0.00999999977 : f32
      %252 = vector.broadcast %cst_147 : f32 to vector<8x1xf32>
      %253 = arith.mulf %252, %249 : vector<8x1xf32>
      %254 = arith.select %251, %249, %253 : vector<8x1xi1>, vector<8x1xf32>
      %cst_148 = arith.constant 1.000000e+00 : f32
      %255 = vector.broadcast %cst_148 : f32 to vector<8x2xf32>
      %256 = arith.subf %22, %255 : vector<8x2xf32>
      %cst_149 = arith.constant 1.000000e+30 : f32
      %257 = vector.broadcast %cst_149 : f32 to vector<8x2xf32>
      %258 = arith.mulf %256, %257 : vector<8x2xf32>
      %259 = vector.broadcast %254 : vector<8x1xf32> to vector<8x2xf32>
      %260 = arith.addf %259, %258 : vector<8x2xf32>
      %cst_150 = arith.constant dense<0xFF800000> : vector<2xf32>
      %261 = vector.multi_reduction <maximumf>, %260, %cst_150 [0] : vector<8x2xf32> to vector<2xf32>
      %262 = vector.shape_cast %261 : vector<2xf32> to vector<1x2xf32>
      %cst_151 = arith.constant dense<0.000000e+00> : vector<8x1xf32>
      %263 = tpu.matmul %22, %262, %cst_151 {dimension_numbers = #tpu.dot_dimension_numbers<[1], [1], [0], [0], [0, 0, 1, 0], [], []>} : vector<8x2xf32>, vector<1x2xf32>, vector<8x1xf32> -> vector<8x1xf32>
      %264 = arith.subf %254, %263 : vector<8x1xf32>
      %265 = math.exp %264 : vector<8x1xf32>
      %cst_152 = arith.constant dense<0.000000e+00> : vector<2x1xf32>
      %266 = tpu.matmul %22, %265, %cst_152 {dimension_numbers = #tpu.dot_dimension_numbers<[0], [0], [1], [1], [0, 1, 1, 1], [], []>} : vector<8x2xf32>, vector<8x1xf32>, vector<2x1xf32> -> vector<2x1xf32>
      %cst_153 = arith.constant dense<0.000000e+00> : vector<8x1xf32>
      %267 = tpu.matmul %22, %266, %cst_153 {dimension_numbers = #tpu.dot_dimension_numbers<[1], [0], [0], [1], [0, 0, 1, 1], [], []>} : vector<8x2xf32>, vector<2x1xf32>, vector<8x1xf32> -> vector<8x1xf32>
      %268 = tpu.reciprocal %267 {approx = true} : vector<8x1xf32> -> vector<8x1xf32>
      %269 = arith.mulf %265, %268 : vector<8x1xf32>
      %270 = vector.broadcast %269 : vector<8x1xf32> to vector<8x16xf32>
      %271 = arith.mulf %235, %270 : vector<8x16xf32>
      %cst_154 = arith.constant dense<0.000000e+00> : vector<2x16xf32>
      %272 = tpu.matmul %22, %271, %cst_154 {dimension_numbers = #tpu.dot_dimension_numbers<[0], [0], [1], [1], [0, 1, 1, 1], [], []>} : vector<8x2xf32>, vector<8x16xf32>, vector<2x16xf32> -> vector<2x16xf32>
      %273 = vector.broadcast %228 : vector<1x16xf32> to vector<2x16xf32>
      %274 = arith.addf %272, %273 : vector<2x16xf32>
      %cst_155 = arith.constant 0.000000e+00 : f32
      %275 = vector.broadcast %cst_155 : f32 to vector<2x16xf32>
      %276 = arith.cmpf ogt, %274, %275 : vector<2x16xf32>
      %277 = math.exp %274 : vector<2x16xf32>
      %cst_156 = arith.constant 1.000000e+00 : f32
      %278 = vector.broadcast %cst_156 : f32 to vector<2x16xf32>
      %279 = arith.subf %277, %278 : vector<2x16xf32>
      %280 = arith.select %276, %274, %279 : vector<2x16xi1>, vector<2x16xf32>
      %281 = tpu.concatenate %280, %arg39 in 1 : vector<2x16xf32>, vector<2x16xf32> -> vector<2x32xf32>
      %282 = vector.extract_strided_slice %229 {offsets = [0, 0, 0], sizes = [1, 32, 16], strides = [1, 1, 1]} : vector<2x32x16xf32> to vector<1x32x16xf32>
      %283 = vector.shape_cast %282 : vector<1x32x16xf32> to vector<32x16xf32>
      %cst_157 = arith.constant dense<0.000000e+00> : vector<2x16xf32>
      %284 = tpu.matmul %281, %283, %cst_157 {dimension_numbers = #tpu.dot_dimension_numbers<[1], [0], [0], [1], [0, 0, 1, 1], [], []>} : vector<2x32xf32>, vector<32x16xf32>, vector<2x16xf32> -> vector<2x16xf32>
      %285 = vector.extract_strided_slice %230 {offsets = [0, 0, 0], sizes = [1, 1, 16], strides = [1, 1, 1]} : vector<2x1x16xf32> to vector<1x1x16xf32>
      %286 = vector.shape_cast %285 : vector<1x1x16xf32> to vector<1x16xf32>
      %287 = vector.broadcast %286 : vector<1x16xf32> to vector<2x16xf32>
      %288 = arith.addf %284, %287 : vector<2x16xf32>
      %289 = arith.negf %288 : vector<2x16xf32>
      %290 = math.exp %289 : vector<2x16xf32>
      %cst_158 = arith.constant 1.000000e+00 : f32
      %291 = vector.broadcast %cst_158 : f32 to vector<2x16xf32>
      %292 = arith.addf %291, %290 : vector<2x16xf32>
      %293 = arith.divf %291, %292 : vector<2x16xf32>
      %294 = vector.extract_strided_slice %229 {offsets = [1, 0, 0], sizes = [1, 32, 16], strides = [1, 1, 1]} : vector<2x32x16xf32> to vector<1x32x16xf32>
      %295 = vector.shape_cast %294 : vector<1x32x16xf32> to vector<32x16xf32>
      %cst_159 = arith.constant dense<0.000000e+00> : vector<2x16xf32>
      %296 = tpu.matmul %281, %295, %cst_159 {dimension_numbers = #tpu.dot_dimension_numbers<[1], [0], [0], [1], [0, 0, 1, 1], [], []>} : vector<2x32xf32>, vector<32x16xf32>, vector<2x16xf32> -> vector<2x16xf32>
      %297 = vector.extract_strided_slice %230 {offsets = [1, 0, 0], sizes = [1, 1, 16], strides = [1, 1, 1]} : vector<2x1x16xf32> to vector<1x1x16xf32>
      %298 = vector.shape_cast %297 : vector<1x1x16xf32> to vector<1x16xf32>
      %299 = vector.broadcast %298 : vector<1x16xf32> to vector<2x16xf32>
      %300 = arith.addf %296, %299 : vector<2x16xf32>
      %301 = arith.negf %300 : vector<2x16xf32>
      %302 = math.exp %301 : vector<2x16xf32>
      %cst_160 = arith.constant 1.000000e+00 : f32
      %303 = vector.broadcast %cst_160 : f32 to vector<2x16xf32>
      %304 = arith.addf %303, %302 : vector<2x16xf32>
      %305 = arith.divf %303, %304 : vector<2x16xf32>
      %cst_161 = arith.constant dense<0.000000e+00> : vector<2x16xf32>
      %306 = tpu.matmul %arg39, %233, %cst_161 {dimension_numbers = #tpu.dot_dimension_numbers<[1], [0], [0], [1], [0, 0, 1, 1], [], []>} : vector<2x16xf32>, vector<16x16xf32>, vector<2x16xf32> -> vector<2x16xf32>
      %307 = vector.broadcast %234 : vector<1x16xf32> to vector<2x16xf32>
      %308 = arith.addf %306, %307 : vector<2x16xf32>
      %cst_162 = arith.constant dense<0.000000e+00> : vector<2x16xf32>
      %309 = tpu.matmul %280, %231, %cst_162 {dimension_numbers = #tpu.dot_dimension_numbers<[1], [0], [0], [1], [0, 0, 1, 1], [], []>} : vector<2x16xf32>, vector<16x16xf32>, vector<2x16xf32> -> vector<2x16xf32>
      %310 = vector.broadcast %232 : vector<1x16xf32> to vector<2x16xf32>
      %311 = arith.addf %309, %310 : vector<2x16xf32>
      %312 = arith.mulf %293, %308 : vector<2x16xf32>
      %313 = arith.addf %311, %312 : vector<2x16xf32>
      %314 = math.tanh %313 : vector<2x16xf32>
      %cst_163 = arith.constant 1.000000e+00 : f32
      %315 = vector.broadcast %cst_163 : f32 to vector<2x16xf32>
      %316 = arith.subf %315, %305 : vector<2x16xf32>
      %317 = arith.mulf %316, %314 : vector<2x16xf32>
      %318 = arith.mulf %305, %arg39 : vector<2x16xf32>
      %319 = arith.addf %317, %318 : vector<2x16xf32>
      %cst_164 = arith.constant 0.000000e+00 : f32
      %320 = vector.broadcast %cst_164 : f32 to vector<2x16xf32>
      %321 = arith.maximumf %319, %320 : vector<2x16xf32>
      scf.yield %321 : vector<2x16xf32>
    }
    %c0_141 = arith.constant 0 : index
    %c0_142 = arith.constant 0 : index
    %242 = vector.load %arg37[%c0_141, %c0_142] : memref<2x16xf32, #tpu.memory_space<vmem>>, vector<2x16xf32>
    tpu.vector_store %arg37[%c0_141, %c0_142], %241 {strides = array<i32>} : memref<2x16xf32, #tpu.memory_space<vmem>>, vector<2x16xf32>,
    return
  }
}

</mosaic_0001>

<bundles_post_ra>
// kernel: tpu_custom_call.1
= control target key start
LH: loop header
LB: loop body
LE: loop exit
PB: predicated region body
PF: predicated region fallthrough
CT: control target
= control target key end

     0   :  { %s3894_s6 = smov 1   ;;  %s3895_s10 = smov 2   ;;  %s4571_s0 = inlined_call_operand.smem [shape: u32[38], index: -1, kind: input, shape index: {}] }
   0x1   :  { %s3948_s5 = sld [smem:[%s4571_s0]]   ;;  %s3896_s14 = smov 3  }
   0x2   :  { %s3953_s9 = sld [smem:[%s4571_s0 + %s3894_s6]]   ;;  %s3897_s18 = smov 4  }
   0x3   :  { %s3958_s13 = sld [smem:[%s4571_s0 + %s3895_s10]]   ;;  %s3898_s22 = smov 5  }
   0x4   :  { %s3963_s17 = sld [smem:[%s4571_s0 + %s3896_s14]]   ;;  %s3899_s26 = smov 6  }
   0x5   :  { %s3968_s21 = sld [smem:[%s4571_s0 + %s3897_s18]]   ;;  %s3900_s30 = smov 7  }
   0x6   :  { %s3973_s25 = sld [smem:[%s4571_s0 + %s3898_s22]]   ;;  %s3901_s4 = smov 8  }
   0x7   :  { %s3978_s29 = sld [smem:[%s4571_s0 + %s3899_s26]]   ;;  %s3902_s10 = smov 9  }
   0x8   :  { %s3983_s3 = sld [smem:[%s4571_s0 + %s3900_s30]]   ;;  %s3903_s15 = smov 10  }
   0x9   :  { %s3988_s8 = sld [smem:[%s4571_s0 + %s3901_s4]]   ;;  %s3904_s20 = smov 11  }
   0xa   :  { %s3993_s14 = sld [smem:[%s4571_s0 + %s3902_s10]]   ;;  %s3905_s26 = smov 12  }
   0xb   :  { %4581 = sst [smem:[#allocation5_spill]] %s3968_s21  ;;  %s3906_s1 = smov 13  }
   0xc   :  { %s3998_s19 = sld [smem:[%s4571_s0 + %s3903_s15]]   ;;  %s3907_s7 = smov 14  }
   0xd   :  { %s4003_s24 = sld [smem:[%s4571_s0 + %s3904_s20]]   ;;  %s3908_s15 = smov 15  }
   0xe   :  { %s4008_s30 = sld [smem:[%s4571_s0 + %s3905_s26]]   ;;  %s3909_s22 = smov 16  }
   0xf   :  { %s4013_s6 = sld [smem:[%s4571_s0 + %s3906_s1]]   ;;  %s3910_s28 = smov 17  }
  0x10   :  { %s4018_s12 = sld [smem:[%s4571_s0 + %s3907_s7]]   ;;  %s3911_s7 = smov 18  }
  0x11   :  { %s4023_s20 = sld [smem:[%s4571_s0 + %s3908_s15]]   ;;  %s3912_s15 = smov 19  }
  0x12   :  { %s4028_s27 = sld [smem:[%s4571_s0 + %s3909_s22]]   ;;  %s3913_s22 = smov 20  }
  0x13   :  { %s4033_s4 = sld [smem:[%s4571_s0 + %s3910_s28]]   ;;  %s3914_s28 = smov 21  }
  0x14   :  { %4582 = sst [smem:[#allocation6_spill]] %s4008_s30 }
  0x15   :  { %s4038_s21 = sld [smem:[%s4571_s0 + %s3911_s7]]   ;;  %s3915_s7 = smov 22  }
  0x16   :  { %4583 = sst [smem:[#allocation7_spill]] %s4018_s12 }
  0x17   :  { %s4043_s12 = sld [smem:[%s4571_s0 + %s3912_s15]]   ;;  %s3916_s15 = smov 23  }
  0x18   :  { %4584 = sst [smem:[#allocation8_spill]] %s4028_s27 }
  0x19   :  { %4585 = sst [smem:[#allocation9_spill]] %s4033_s4 }
  0x1a   :  { %s4048_s27 = sld [smem:[%s4571_s0 + %s3913_s22]]   ;;  %s3917_s22 = smov 24  }
  0x1b   :  { %4586 = sst [smem:[#allocation10_spill]] %s4038_s21 }
  0x1c   :  { %s4053_s4 = sld [smem:[%s4571_s0 + %s3914_s28]]   ;;  %s3918_s28 = smov 25  }
  0x1d   :  { %4587 = sst [smem:[#allocation11_spill]] %s4043_s12 }
  0x1e   :  { %s4058_s21 = sld [smem:[%s4571_s0 + %s3915_s7]]   ;;  %s3919_s7 = smov 26  }
  0x1f   :  { %s4063_s12 = sld [smem:[%s4571_s0 + %s3916_s15]]   ;;  %s3920_s15 = smov 27  }
  0x20   :  { %4588 = sst [smem:[#allocation12_spill]] %s4048_s27 }
  0x21   :  { %s4068_s27 = sld [smem:[%s4571_s0 + %s3917_s22]]   ;;  %s3921_s22 = smov 28  }
  0x22   :  { %4589 = sst [smem:[#allocation13_spill]] %s4053_s4 }
  0x23   :  { %s4073_s4 = sld [smem:[%s4571_s0 + %s3918_s28]]   ;;  %s3922_s28 = smov 29  }
  0x24   :  { %4590 = sst [smem:[#allocation14_spill]] %s4058_s21 }
  0x25   :  { %s4078_s21 = sld [smem:[%s4571_s0 + %s3919_s7]]   ;;  %s3923_s7 = smov 30  }
  0x26   :  { %s4083_s30 = sld [smem:[%s4571_s0 + %s3920_s15]]   ;;  %s3924_s15 = smov 31  }
  0x27   :  { %4591 = sst [smem:[#allocation15_spill]] %s4068_s27 }
  0x28   :  { %s4088_s27 = sld [smem:[%s4571_s0 + %s3921_s22]]   ;;  %s3925_s22 = smov 32  }
  0x29   :  { %4592 = sst [smem:[#allocation16_spill]] %s4073_s4 }
  0x2a   :  { %s4093_s4 = sld [smem:[%s4571_s0 + %s3922_s28]]   ;;  %s3926_s28 = smov 33  }
  0x2b   :  { %4593 = sst [smem:[#allocation17_spill]] %s4078_s21 }
  0x2c   :  { %4594 = sst [smem:[#allocation18_spill]] %s4083_s30 }
  0x2d   :  { %s4098_s21 = sld [smem:[%s4571_s0 + %s3923_s7]]   ;;  %s3927_s7 = smov 34  }
  0x2e   :  { %4595 = sst [smem:[#allocation19_spill]] %s4088_s27 }
  0x2f   :  { %s4103_s30 = sld [smem:[%s4571_s0 + %s3924_s15]]   ;;  %s3928_s15 = smov 35  }
  0x30   :  { %4596 = sst [smem:[#allocation20_spill]] %s4093_s4 }
  0x31   :  { %s4108_s27 = sld [smem:[%s4571_s0 + %s3925_s22]]   ;;  %s3929_s22 = smov 36  }
  0x32   :  { %s4113_s4 = sld [smem:[%s4571_s0 + %s3926_s28]]   ;;  %s3930_s28 = smov 37  }
  0x33   :  { %4597 = sst [smem:[#allocation21_spill]] %s4098_s21 }
  0x34   :  { %s4118_s21 = sld [smem:[%s4571_s0 + %s3927_s7]]  }
  0x35   :  { %4598 = sst [smem:[#allocation22_spill]] %s4103_s30 }
  0x36   :  { %s4123_s30 = sld [smem:[%s4571_s0 + %s3928_s15]]  }
  0x37   :  { %4599 = sst [smem:[#allocation23_spill]] %s4108_s27 }
  0x38   :  { %4600 = sst [smem:[#allocation24_spill]] %s4113_s4 }
  0x39   :  { %s4128_s27 = sld [smem:[%s4571_s0 + %s3929_s22]]  }
  0x3a   :  { %s4133_s4 = sld [smem:[%s4571_s0 + %s3930_s28]]  }
  0x3b   :  { %80 = vsyncpa [#allocation3], 0  ;;  %v191_v0 = vld [vmem:[%s3973_s25 + $0x8] sm:$0xff]  ;;  %v190_v1 = vld [vmem:[%s3973_s25] sm:$0xff]  ;;  %v3931_v2 = vmov 0.0   ;;  %vm3932_vm0 = vmmov 0   ;;  %v160_v15 = vlaneseq }
  0x3c   :  { %3498 = vmatprep.subr.mxu0 %v3931_v2  ;;  %3502 = vmatprep.mubr.msk.f32.mxu0 %vm3932_vm0, %v3931_v2  ;;  %v4141_v3 = vld [vmem:[%s3948_s5] sm:$0xff]  ;;  %vm198_vm1 = vcmask 130048   ;;  %v3933_v7 = vmov 0   ;;  %v159_v9 = vld [vmem:[%s3958_s13 + $0x8] sm:$0xf]  ;;  %vm272_vm2 = vcmask 64512  }
  0x3d   :  { %v3312_v4 = vld [vmem:[%s3993_s14] ss:$0 sm:$0xff]  ;;  %3499 = vmatpush3.msra.mxu0 %v191_v0  ;;  %3796 = vset.pattern.permute.xlu0 %v3933_v7  ;;  %v173_v10 = vld [vmem:[%s3963_s17 + $0x8] sm:$0xf]  ;;  %v4158_v16 = vand.u32 127, %v160_v15  ;;  %vm452_vm9 = vcmask 125952  }
  0x3e   :  { %v158_v5 = vld [vmem:[%s3958_s13] sm:$0xff]  ;;  %v462_v6 = vmul.f32 %v3312_v4, %v4141_v3  ;;  %3500 = vmatprep.subr.mxu0 %v3931_v2  ;;  %3797 = vset.pattern.permute.xlu1 %v3933_v7  ;;  %v157_v14 = vld [vmem:[%s3953_s9 + $0x8] sm:$0xf]  ;;  %vm572_vm12 = vcmask 60416   ;;  %vm631_vm13 = vcmask 1043456   ;;  %vm627_vm14 = vcmask 97280  }
  0x3f   :  { %163 = vperm.xlu0 %3796, %v158_v5   ;;  %3501 = vmatpush3.msra.mxu0 %v190_v1  ;;  %v172_v11 = vld [vmem:[%s3963_s17] sm:$0xff]  ;;  %s3934_s0 = smov 16   ;;  %s4601_s5 = sld [smem:[#allocation6_spill]] }
  0x40   :  { %v463_v8 = vsel %vm198_vm1, %v462_v6, 0.0  ;;  %3503 = vmatmul.mubr.msk.f32.vlgmr.msra.gmra.mxu0 %vm198_vm1, %v4141_v3  ;;  %v192_v12 = vld [vmem:[%s3978_s29] sm:$0xff]  ;;  %s4603_s13 = sld [smem:[#allocation7_spill]]  ;;  %s4473_s15 = smov 0  }
  0x41   :  { %464 = vadd.xlane.f32.xlu1 %v463_v8  ;;  %v156_v13 = vld [vmem:[%s3953_s9] sm:$0xff]  ;;  %3505 = vmatprep.subr.mxu1 %v192_v12  ;;  %s4602_s9 = sld [smem:[#allocation8_spill]] }
  0x42   :  { %3507 = vmatprep.mubr.msk.f32.mxu1 %vm272_vm2, %v156_v13  ;;  %3506 = vmatpush3.msra.mxu1 %v192_v12  ;;  %v3311_v35 = vld [vmem:[%s3988_s8] ss:$0 sm:$0xff]  ;;  %s4604_s17 = sld [smem:[#allocation16_spill]] }
  0x43   :  { %166 = vperm.xlu0 %3796, %v159_v9   ;;  %3508 = vmatmul.mubr.msk.f32.vlgmr.msra.gmra.mxu1 %vm272_vm2, %v157_v14  ;;  %s4605_s25 = sld [smem:[#allocation15_spill]] }
  0x44   :  { %s4606_s29 = sld [smem:[#allocation5_spill]] }
  0x45   :  { %s4608_s8 = sld [smem:[#allocation17_spill]] }
  0x46   :  { %s4609_s14 = sld [smem:[#allocation13_spill]] }
  0x47   :  { %178 = vperm.xlu0 %3796, %v173_v10   ;;  %s4615_s7 = sld [smem:[#allocation24_spill]] }
  0x48   :  { %s4616_s10 = sld [smem:[#allocation18_spill]] }
  0x49   :  { %s4617_s11 = sld [smem:[#allocation10_spill]] }
  0x52   :  { %175 = vperm.xlu1 %3797, %v172_v11  }
  0xba   :  { %v164_v17 = vpop.permute.xlu0 %163 }
  0xbb   :  { %vm168_vm3 = vcmp.eq.s32.totalorder %v4158_v16, %v164_v17 }
  0xbc   :  { %v4162_v18 = vsel %vm168_vm3, 1.0, %v3931_v2  ;;  %vm987_vm3 = vcmask 261120  }
  0xbd   :  { %3512 = vmatprep.mubr.msk.f32.mxu1 %vm272_vm2, %v4162_v18 }
  0xbe   :  { %v167_v19 = vpop.permute.xlu0 %166 }
  0xbf   :  { %vm169_vm6 = vcmp.eq.s32.totalorder %v4158_v16, %v167_v19 }
  0xc0   :  { %v4182_v26 = vsel %vm169_vm6, 1.0, %v3931_v2 }
  0xc2   :  { %v179_v20 = vpop.permute.xlu0 %178 }
  0xc3   :  { %vm181_vm4 = vcmp.eq.s32.totalorder %v4158_v16, %v179_v20 }
  0xc4   :  { %v4169_v23 = vsel %vm181_vm4, 1.0, %v3931_v2 }
  0xc5   :  { %v3316_v53 = vadd.f32 -1.0, %v4169_v23 }
  0xc7   :  { %v4199_v55 = vmul.f32 1e+30, %v3316_v53 }
  0xca   :  { %v465_v21 = vpop.xlane.xlu1 %464 }
  0xcb   :  { %3515 = vmatprep.subr.mxu0 %v465_v21 }
  0xcc   :  { %3516 = vmatpush3.msra.mxu0 %v465_v21  ;;  %v194_v21 = vld [vmem:[%s3983_s3 + $0x8] sm:$0xff] }
  0xce   :  { %v176_v22 = vpop.permute.xlu1 %175 }
  0xcf   :  { %vm180_vm5 = vcmp.eq.s32.totalorder %v4158_v16, %v176_v22 }
  0xd0   :  { %v4172_v24 = vsel %vm180_vm5, 1.0, %v3931_v2 }
  0xd1   :  { %3517 = vmatprep.mubr.msk.f32.mxu0 %vm272_vm2, %v4172_v24  ;;  %v3315_v54 = vadd.f32 -1.0, %v4172_v24 }
  0xd2   :  { %3518 = vmatmul.mubr.msk.f32.vlgmr.msra.gmra.mxu0 %vm272_vm2, %v4169_v23 }
  0xd3   :  { %3529 = vmatprep.mubr.msk.f32.mxu0 %vm272_vm2, %v4172_v24  ;;  %v4202_v58 = vmul.f32 1e+30, %v3315_v54 }
 0x100   :  { %v268_v25 = vpop.f32.mrf.mxu0 }
 0x101   :  { %3510 = vmatprep.subr.mxu1 %v268_v25 }
 0x102   :  { %v3504_v27 = vpop.f32.mrf.mxu0  ;;  %3511 = vmatpush3.msra.mxu1 %v268_v25 }
 0x103   :  { %3513 = vmatmul.mubr.msk.f32.vlgmr.msra.gmra.mxu1 %vm272_vm2, %v4182_v26  ;;  %3520 = vmatprep.subr.mxu1 %v3931_v2  ;;  %v3509_v28 = vpop.f32.mrf.mxu1  ;;  %v193_v27 = vld [vmem:[%s3983_s3] sm:$0xff]  ;;  %s4607_s3 = sld [smem:[#allocation9_spill]] }
 0x104   :  { %3524 = vmatprep.mubr.msk.f32.mxu1 %vm3932_vm0, %v3931_v2 }
 0x105   :  { %v345_v29 = vpop.f32.mrf.mxu1 }
 0x192   :  { %v3519_v43 = vpop.f32.mrf.mxu0 }
 0x194   :  { %v538_v46 = vpop.f32.mrf.mxu0 }
 0x1c3   :  { %v3514_v30 = vpop.f32.mrf.mxu1 }
 0x1c4   :  { %v432_v31 = vadd.f32 %v3514_v30, %v3509_v28 }
 0x1c5   :  { %v426_v32 = vpop.f32.mrf.mxu1 }
 0x1c6   :  { %vm436_vm7 = vcmp.gt.f32.partialorder %v432_v31, 0.0  ;;  %v438_v33 = vmul.f32 0.01, %v432_v31  ;;  %v427_v34 = vadd.f32 %v426_v32, %v345_v29 }
 0x1c8   :  { %vm435_vm8 = vcmp.gt.f32.partialorder %v427_v34, 0.0  ;;  %v437_v36 = vmul.f32 0.01, %v427_v34  ;;  %v4190_v37 = vsel %vm436_vm7, %v432_v31, %v438_v33 }
 0x1c9   :  { %v448_v38 = vmul.f32 %v3311_v35, %v4190_v37 }
 0x1ca   :  { %v4193_v39 = vsel %vm435_vm8, %v427_v34, %v437_v36 }
 0x1cb   :  { %v453_v40 = vsel %vm452_vm9, %v448_v38, 0.0  ;;  %v447_v41 = vmul.f32 %v3311_v35, %v4193_v39 }
 0x1cc   :  { %454 = vadd.xlane.f32.xlu1 %v453_v40 }
 0x1cd   :  { %v449_v42 = vsel %vm198_vm1, %v447_v41, 0.0 }
 0x1ce   :  { %450 = vadd.xlane.f32.xlu0 %v449_v42  ;;  %v964_v42 = vld [vmem:[%s4003_s24 + $0x18] sm:$0xff] }
 0x255   :  { %v455_v44 = vpop.xlane.xlu1 %454 }
 0x256   :  { %v548_v45 = vadd.f32 %v3519_v43, %v455_v44  ;;  %v968_v43 = vld [vmem:[%s4003_s24 + $0x38] sm:$0xff]  ;;  %v963_v44 = vld [vmem:[%s4003_s24 + $0x10] sm:$0xff] }
 0x257   :  { %v451_v47 = vpop.xlane.xlu0 %450 }
 0x258   :  { %v552_v48 = vmul.f32 0.01, %v548_v45  ;;  %v547_v49 = vadd.f32 %v538_v46, %v451_v47  ;;  %vm550_vm10 = vcmp.gt.f32.partialorder %v548_v45, 0.0  ;;  %v962_v46 = vld [vmem:[%s4003_s24 + $0x8] sm:$0xff] }
 0x259   :  { %v966_v47 = vld [vmem:[%s4003_s24 + $0x28] sm:$0xff] }
 0x25a   :  { %v551_v50 = vmul.f32 0.01, %v547_v49  ;;  %v554_v51 = vsel %vm550_vm10, %v548_v45, %v552_v48  ;;  %vm549_vm11 = vcmp.gt.f32.partialorder %v547_v49, 0.0  ;;  %v967_v45 = vld [vmem:[%s4003_s24 + $0x30] sm:$0xff]  ;;  %v961_v48 = vld [vmem:[%s4003_s24] sm:$0xff] }
 0x25b   :  { %566 = vperm.xlu1 %3797, %v554_v51  }
 0x25c   :  { %v553_v52 = vsel %vm549_vm11, %v547_v49, %v551_v50  ;;  %v965_v49 = vld [vmem:[%s4003_s24 + $0x20] sm:$0xff]  ;;  %s4611_s24 = sld [smem:[#allocation20_spill]] }
 0x25d   :  { %561 = vperm.xlu0 %3796, %v553_v52   ;;  %v3323_v50 = vld [vmem:[%s3998_s19] ss:$0 sm:$0xff]  ;;  %s4610_s19 = sld [smem:[#allocation11_spill]] }
 0x2d6   :  { %v567_v56 = vpop.permute.xlu1 %566 }
 0x2d7   :  { %v570_v57 = vadd.f32 %v567_v56, %v4199_v55 }
 0x2d8   :  { %v562_v59 = vpop.permute.xlu0 %561 }
 0x2d9   :  { %v569_v60 = vadd.f32 %v562_v59, %v4202_v58  ;;  %v573_v61 = vsel %vm572_vm12, %v570_v57, -inf }
 0x2db   :  { %v571_v62 = vsel %vm272_vm2, %v569_v60, -inf }
 0x2dc   :  { %v574_v63 = vmax.f32 %v571_v62, %v573_v61  ;;  %v972_v61 = vld [vmem:[%s4013_s6 + $0x8] sm:$0xff] }
 0x2de   :  { %v575_v0 = vrot.slane %v574_v63, 4 }
 0x2e0   :  { %v576_v1 = vmax.f32 %v574_v63, %v575_v0  ;;  %v975_v63 = vld [vmem:[%s4023_s20 + $0x8] sm:$0xff]  ;;  %v971_v0 = vld [vmem:[%s4013_s6] sm:$0xff]  ;;  %s4612_s6 = sld [smem:[#allocation21_spill]] }
 0x2e2   :  { %v577_v4 = vrot.slane %v576_v1, 2 }
 0x2e4   :  { %v578_v5 = vmax.f32 %v576_v1, %v577_v4  ;;  %v974_v1 = vld [vmem:[%s4023_s20] sm:$0xff]  ;;  %v1313_v4 = vld [vmem:[%s4063_s12 + $0x8] sm:$0xff]  ;;  %s4614_s20 = sld [smem:[#allocation23_spill]] }
 0x2e6   :  { %v579_v6 = vrot.slane %v578_v5, 1 }
 0x2e8   :  { %v580_v7 = vmax.f32 %v578_v5, %v579_v6  ;;  %v1312_v5 = vld [vmem:[%s4063_s12] sm:$0xff]  ;;  %s4613_s12 = sld [smem:[#allocation22_spill]] }
 0x2e9   :  { %v3327_v6 = vld [vmem:[%s4601_s5] ss:$0 sm:$0xff] }
 0x2ea   :  { %v582_v8 = vmul.f32 %v580_v7, %v4169_v23  ;;  %v581_v9 = vmul.f32 %v580_v7, %v4172_v24 }
 0x2ec   :  { %v586_v10 = vsel %vm572_vm12, %v582_v8, 0.0  ;;  %v583_v11 = vsel %vm272_vm2, %v581_v9, 0.0 }
 0x2ed   :  { %587 = vadd.xlane.f32.xlu0 %v586_v10  ;;  %584 = vadd.xlane.f32.xlu1 %v583_v11 }
 0x31a   :  { %595 = vxpose.xlu0.b32.start [1/2] (short) (narrow) %v4172_v24, 8 }
 0x31e   :  { %596 = vxpose.xlu0.b32.end [2/2] (short) (narrow) %v4169_v23, 8 }
 0x376   :  { %v588_v12 = vpop.xlane.xlu0 %587  ;;  %v585_v13 = vpop.xlane.xlu1 %584 }
 0x377   :  { %v590_v14 = vsub.f32 %v554_v51, %v588_v12  ;;  %v589_v15 = vsub.f32 %v553_v52, %v585_v13  ;;  %v3330_v13 = vld [vmem:[%s4601_s5 + $0x1] ss:$0 sm:$0xff] }
 0x379   :  { %v593_v17 = vmul.f32 1.442695, %v590_v14  ;;  %v591_v19 = vmul.f32 1.442695, %v589_v15 }
 0x37b   :  { %3798 = vpow2.f32 %v593_v17 }
 0x37c   :  { %3800 = vpow2.f32 %v591_v19 }
 0x388   :  { %v3799_v20 = vpop.eup %3798 }
 0x389   :  { %3521 = vmatpush3.msk.msra.mxu1 %vm631_vm13, %v3799_v20  ;;  %v3801_v22 = vpop.eup %3800 }
 0x38a   :  { %3522 = vmatprep.subr.mxu1 %v3931_v2 }
 0x38b   :  { %3523 = vmatpush3.msra.mxu1 %v3801_v22 }
 0x38c   :  { %3532 = vmatprep.subr.mxu1 %v194_v21 }
 0x396   :  { %v4216_v25 = vpop.trf.xlu0 }
 0x397   :  { %3525 = vmatmul.mubr.msk.f32.vlgmr.msra.gmra.mxu1 %vm627_vm14, %v4216_v25 }
 0x398   :  { %3533 = vmatpush3.msra.mxu1 %v194_v21  ;;  %3536 = vmatprep.mubr.msk.f32.mxu1 %vm198_vm1, %v4193_v39 }
 0x399   :  { %3534 = vmatprep.subr.mxu1 %v193_v27 }
 0x39a   :  { %3535 = vmatpush3.msra.mxu1 %v193_v27 }
 0x39b   :  { %3537 = vmatmul.mubr.msk.f32.vlgmr.msra.gmra.mxu1 %vm198_vm1, %v4190_v37  ;;  %3546 = vmatprep.subr.mxu1 %v3931_v2 }
 0x39c   :  { %3554 = vmatprep.mubr.msk.f32.mxu1 %vm3932_vm0, %v3931_v2  ;;  %3547 = vmatpush3.msra.mxu1 %v964_v42 }
 0x39d   :  { %3548 = vmatprep.subr.mxu1 %v3931_v2 }
 0x39e   :  { %3549 = vmatpush3.msra.mxu1 %v963_v44  ;;  %v3339_v44 = vld [vmem:[%s4604_s17] ss:$0 sm:$0xff] }
 0x39f   :  { %3550 = vmatprep.subr.mxu1 %v3931_v2 }
 0x3a0   :  { %3551 = vmatpush3.msra.mxu1 %v962_v46 }
 0x3a1   :  { %3552 = vmatprep.subr.mxu1 %v3931_v2 }
 0x3a2   :  { %3553 = vmatpush3.msra.mxu1 %v961_v48 }
 0x3a3   :  { %3568 = vmatprep.subr.mxu1 %v3931_v2 }
 0x457   :  { %v701_v28 = vpop.f32.mrf.mxu1 }
 0x458   :  { %3527 = vmatprep.subr.mxu0 %v701_v28 }
 0x459   :  { %v3526_v29 = vpop.f32.mrf.mxu1  ;;  %3528 = vmatpush3.msra.mxu0 %v701_v28 }
 0x45a   :  { %3530 = vmatmul.mubr.msk.f32.vlgmr.msra.gmra.mxu0 %vm272_vm2, %v4169_v23  ;;  %3539 = vmatprep.subr.mxu0 %v3931_v2  ;;  %v3333_v29 = vld [vmem:[%s4602_s9] ss:$0 sm:$0xff] }
 0x45b   :  { %3543 = vmatprep.mubr.msk.f32.mxu0 %vm3932_vm0, %v3931_v2  ;;  %v3538_v36 = vpop.f32.mrf.mxu1 }
 0x45d   :  { %v856_v39 = vpop.f32.mrf.mxu1 }
 0x51a   :  { %v3531_v30 = vpop.f32.mrf.mxu0 }
 0x51b   :  { %3802 = vrcp.f32 %v3531_v30 }
 0x51c   :  { %v771_v31 = vpop.f32.mrf.mxu0 }
 0x51d   :  { %3804 = vrcp.f32 %v771_v31 }
 0x528   :  { %v3803_v32 = vpop.eup %3802 }
 0x529   :  { %v783_v33 = vmul.f32 %v3803_v32, %v3799_v20  ;;  %v3335_v32 = vld [vmem:[%s4603_s13] ss:$0 sm:$0xff] }
 0x52a   :  { %v3805_v34 = vpop.eup %3804 }
 0x52b   :  { %872 = vperm.xlu1 %3797, %v783_v33   ;;  %v782_v35 = vmul.f32 %v3805_v34, %v3801_v22 }
 0x52f   :  { %867 = vperm.xlu1 %3797, %v782_v35  }
 0x533   :  { %977 = vrot.lane.b32.xlu1 %v4141_v3, %s3934_s0 }
 0x5a6   :  { %v873_v37 = vpop.permute.xlu1 %872 }
 0x5a7   :  { %v876_v38 = vmul.f32 %v3538_v36, %v873_v37 }
 0x5a9   :  { %3540 = vmatpush3.msk.msra.mxu0 %vm631_vm13, %v876_v38 }
 0x5aa   :  { %v868_v40 = vpop.permute.xlu1 %867  ;;  %3541 = vmatprep.subr.mxu0 %v3931_v2 }
 0x5ab   :  { %v875_v41 = vmul.f32 %v868_v40, %v856_v39 }
 0x5ad   :  { %3542 = vmatpush3.msra.mxu0 %v875_v41 }
 0x5ae   :  { %3544 = vmatmul.mubr.msk.f32.vlgmr.msra.gmra.mxu0 %vm627_vm14, %v4216_v25  ;;  %3557 = vmatprep.subr.mxu0 %v3931_v2  ;;  %v978_v57 = vpop.permute.xlu1 %977 }
 0x5af   :  { %3565 = vmatprep.mubr.msk.f32.mxu0 %vm3932_vm0, %v3931_v2  ;;  %3558 = vmatpush3.msra.mxu0 %v968_v43 }
 0x5b0   :  { %3559 = vmatprep.subr.mxu0 %v3931_v2 }
 0x5b1   :  { %3560 = vmatpush3.msra.mxu0 %v967_v45  ;;  %v3338_v45 = vld [vmem:[%s4605_s25] ss:$0 sm:$0xff] }
 0x5b2   :  { %3561 = vmatprep.subr.mxu0 %v3931_v2 }
 0x5b3   :  { %3562 = vmatpush3.msra.mxu0 %v966_v47 }
 0x5b4   :  { %3563 = vmatprep.subr.mxu0 %v3931_v2 }
 0x5b5   :  { %3564 = vmatpush3.msra.mxu0 %v965_v49 }
 0x5b6   :  { %3575 = vmatprep.subr.mxu0 %v3931_v2 }
 0x66e   :  { %v952_v51 = vpop.f32.mrf.mxu0 }
 0x66f   :  { %v953_v52 = vadd.f32 %v3323_v50, %v952_v51 }
 0x670   :  { %v3545_v53 = vpop.f32.mrf.mxu0 }
 0x671   :  { %v957_v54 = vmul.f32 1.442695, %v953_v52  ;;  %vm956_vm15 = vcmp.gt.f32.partialorder %v953_v52, 0.0 }
 0x673   :  { %3806 = vpow2.f32 %v957_v54 }
 0x680   :  { %v3807_v56 = vpop.eup %3806 }
 0x681   :  { %v3326_v59 = vadd.f32 -1.0, %v3807_v56 }
 0x683   :  { %v960_v60 = vsel %vm956_vm15, %v953_v52, %v3326_v59 }
 0x684   :  { %v980_v62 = vsel %vm198_vm1, %v960_v60, %v978_v57 }
 0x685   :  { %3555 = vmatmul.mubr.msk.f32.vlgmr.msra.gmra.mxu1 %vm987_vm3, %v980_v62  ;;  %3566 = vmatmul.mubr.msk.f32.vlgmr.msra.gmra.mxu0 %vm987_vm3, %v980_v62 }
 0x686   :  { %3576 = vmatpush3.msra.mxu0 %v972_v61  ;;  %3579 = vmatprep.mubr.msk.f32.mxu0 %vm3932_vm0, %v3931_v2 }
 0x687   :  { %3577 = vmatprep.subr.mxu0 %v3931_v2  ;;  %3569 = vmatpush3.msra.mxu1 %v975_v63 }
 0x688   :  { %3578 = vmatpush3.msra.mxu0 %v971_v0  ;;  %3570 = vmatprep.subr.mxu1 %v3931_v2 }
 0x689   :  { %3580 = vmatmul.mubr.msk.f32.vlgmr.msra.gmra.mxu0 %vm198_vm1, %v960_v60  ;;  %3571 = vmatpush3.msra.mxu1 %v974_v1 }
 0x68a   :  { %3591 = vmatprep.mubr.msk.f32.mxu0 %vm272_vm2, %v4172_v24  ;;  %3572 = vmatprep.mubr.msk.f32.mxu1 %vm3932_vm0, %v3931_v2 }
 0x68b   :  { %3573 = vmatmul.mubr.msk.f32.vlgmr.msra.gmra.mxu1 %vm198_vm1, %v4141_v3  ;;  %3582 = vmatprep.subr.mxu1 %v3931_v2 }
 0x68c   :  { %3586 = vmatprep.mubr.msk.f32.mxu1 %vm3932_vm0, %v3931_v2  ;;  %3583 = vmatpush3.msra.mxu1 %v1313_v4 }
 0x68d   :  { %3584 = vmatprep.subr.mxu1 %v3931_v2 }
 0x68e   :  { %3585 = vmatpush3.msra.mxu1 %v1312_v5 }
 0x745   :  { %v1057_v7 = vpop.f32.mrf.mxu1  ;;  %v1139_v8 = vpop.f32.mrf.mxu0 }
 0x746   :  { %v1058_v9 = vadd.f32 %v3327_v6, %v1057_v7  ;;  %v1140_v19 = vadd.f32 %v3330_v13, %v1139_v8 }
 0x747   :  { %v3556_v10 = vpop.f32.mrf.mxu1  ;;  %v3567_v11 = vpop.f32.mrf.mxu0 }
 0x748   :  { %v3329_v12 = vmul.f32 -1.442695, %v1058_v9  ;;  %v3332_v21 = vmul.f32 -1.442695, %v1140_v19 }
 0x749   :  { %v1300_v14 = vpop.f32.mrf.mxu0 }
 0x74a   :  { %3808 = vpow2.f32 %v3329_v12  ;;  %v1301_v34 = vadd.f32 %v3335_v32, %v1300_v14 }
 0x74b   :  { %v3581_v15 = vpop.f32.mrf.mxu0  ;;  %v1221_v17 = vpop.f32.mrf.mxu1  ;;  %3810 = vpow2.f32 %v3332_v21 }
 0x74c   :  { %v1222_v31 = vadd.f32 %v3333_v29, %v1221_v17 }
 0x74d   :  { %v3574_v20 = vpop.f32.mrf.mxu1 }
 0x757   :  { %v3809_v22 = vpop.eup %3808 }
 0x758   :  { %v1064_v27 = vadd.f32 1.0, %v3809_v22  ;;  %v3811_v28 = vpop.eup %3810 }
 0x759   :  { %v1146_v30 = vadd.f32 1.0, %v3811_v28 }
 0x75a   :  { %3812 = vrcp.f32 %v1064_v27 }
 0x75b   :  { %3814 = vrcp.f32 %v1146_v30 }
 0x767   :  { %v3813_v33 = vpop.eup %3812 }
 0x768   :  { %v1304_v35 = vmul.f32 %v3813_v33, %v1222_v31  ;;  %v3815_v37 = vpop.eup %3814 }
 0x769   :  { %v1307_v38 = vsub.f32 1.0, %v3815_v37  ;;  %v1309_v41 = vmul.f32 %v3815_v37, %v4141_v3  ;;  %v184_v37 = vld [vmem:[%s4606_s29] sm:$0xff] }
 0x76a   :  { %v1305_v36 = vadd.f32 %v1304_v35, %v1301_v34 }
 0x76c   :  { %3816 = vtanh.f32 %v1305_v36 }
 0x779   :  { %v3817_v39 = vpop.eup %3816 }
 0x77a   :  { %v1308_v40 = vmul.f32 %v3817_v39, %v1307_v38 }
 0x77c   :  { %v1310_v42 = vadd.f32 %v1309_v41, %v1308_v40 }
 0x77e   :  { %v4288_v43 = vmax.f32 %v1310_v42, 0.0 }
 0x780   :  { %3587 = vmatmul.mubr.msk.f32.vlgmr.msra.gmra.mxu1 %vm198_vm1, %v4288_v43 }
 0x781   :  { %3596 = vmatprep.mubr.msk.f32.mxu1 %vm272_vm2, %v4162_v18 }
 0x840   :  { %v4296_v46 = vpop.f32.mrf.mxu1 }
 0x841   :  { %v1406_v47 = vmul.f32 %v3339_v44, %v4296_v46  ;;  %v1396_v48 = vmul.f32 %v3338_v45, %v4296_v46 }
 0x842   :  { %v3588_v49 = vpop.f32.mrf.mxu1 }
 0x843   :  { %v1407_v3 = vsel %vm198_vm1, %v1406_v47, 0.0  ;;  %v1397_v50 = vsel %vm198_vm1, %v1396_v48, 0.0  ;;  %v1927_v47 = vld [vmem:[%s4607_s3 + $0x18] sm:$0xff]  ;;  %v1930_v49 = vld [vmem:[%s4607_s3 + $0x30] sm:$0xff] }
 0x844   :  { %1408 = vadd.xlane.f32.xlu0 %v1407_v3  ;;  %1398 = vadd.xlane.f32.xlu1 %v1397_v50  ;;  %v1931_v48 = vld [vmem:[%s4607_s3 + $0x38] sm:$0xff]  ;;  %v1929_v3 = vld [vmem:[%s4607_s3 + $0x28] sm:$0xff]  ;;  %v1924_v50 = vld [vmem:[%s4607_s3] sm:$0xff] }
 0x8cd   :  { %v1409_v51 = vpop.xlane.xlu0 %1408  ;;  %v1399_v52 = vpop.xlane.xlu1 %1398 }
 0x8ce   :  { %3589 = vmatprep.subr.mxu0 %v1409_v51  ;;  %3594 = vmatprep.subr.mxu1 %v1399_v52 }
 0x8cf   :  { %3590 = vmatpush3.msra.mxu0 %v1409_v51  ;;  %3595 = vmatpush3.msra.mxu1 %v1399_v52  ;;  %v1928_v51 = vld [vmem:[%s4607_s3 + $0x20] sm:$0xff] }
 0x8d0   :  { %3592 = vmatmul.mubr.msk.f32.vlgmr.msra.gmra.mxu0 %vm272_vm2, %v4169_v23  ;;  %3597 = vmatmul.mubr.msk.f32.vlgmr.msra.gmra.mxu1 %vm272_vm2, %v4182_v26  ;;  %v3350_v52 = vld [vmem:[%s4608_s8] ss:$0 sm:$0xff] }
 0x8d1   :  { %3608 = vmatprep.mubr.msk.f32.mxu1 %vm272_vm2, %v4172_v24  ;;  %3599 = vmatprep.subr.mxu0 %v3931_v2 }
 0x8d2   :  { %3603 = vmatprep.mubr.msk.f32.mxu0 %vm3932_vm0, %v3931_v2 }
 0x990   :  { %v3593_v53 = vpop.f32.mrf.mxu0  ;;  %v3598_v54 = vpop.f32.mrf.mxu1 }
 0x991   :  { %v1557_v59 = vadd.f32 %v3598_v54, %v3593_v53 }
 0x992   :  { %v1476_v56 = vpop.f32.mrf.mxu0  ;;  %v1551_v57 = vpop.f32.mrf.mxu1 }
 0x993   :  { %v1552_v60 = vadd.f32 %v1551_v57, %v1476_v56  ;;  %v1563_v62 = vmul.f32 0.01, %v1557_v59  ;;  %vm1561_vm5 = vcmp.gt.f32.partialorder %v1557_v59, 0.0 }
 0x995   :  { %v1562_v61 = vmul.f32 0.01, %v1552_v60  ;;  %vm1560_vm4 = vcmp.gt.f32.partialorder %v1552_v60, 0.0  ;;  %v1565_v0 = vsel %vm1561_vm5, %v1557_v59, %v1563_v62  ;;  %v1938_v62 = vld [vmem:[%s4609_s14 + $0x8] sm:$0xff] }
 0x997   :  { %v1564_v63 = vsel %vm1560_vm4, %v1552_v60, %v1562_v61 }
 0x998   :  { %1568 = vperm.xlu1 %3797, %v1564_v63  }
 0x99c   :  { %1573 = vperm.xlu1 %3797, %v1565_v0  }
 0xa13   :  { %v1569_v1 = vpop.permute.xlu1 %1568 }
 0xa14   :  { %v1576_v4 = vadd.f32 %v1569_v1, %v4202_v58  ;;  %v1937_v1 = vld [vmem:[%s4609_s14] sm:$0xff] }
 0xa16   :  { %v1578_v7 = vsel %vm272_vm2, %v1576_v4, -inf  ;;  %v1934_v4 = vld [vmem:[%s4610_s19] sm:$0xff] }
 0xa17   :  { %v1574_v5 = vpop.permute.xlu1 %1573 }
 0xa18   :  { %v1577_v6 = vadd.f32 %v1574_v5, %v4199_v55  ;;  %v4392_v5 = vld [vmem:[%s4611_s24] ss:$0 sm:$0xff] }
 0xa1a   :  { %v1579_v8 = vsel %vm572_vm12, %v1577_v6, -inf  ;;  %v4395_v6 = vld [vmem:[%s4612_s6] ss:$0 sm:$0xff] }
 0xa1b   :  { %v1580_v9 = vmax.f32 %v1578_v7, %v1579_v8  ;;  %v4398_v7 = vld [vmem:[%s4613_s12] sm:$0xff]  ;;  %v4401_v8 = vld [vmem:[%s4613_s12 + $0x8] sm:$0xff] }
 0xa1d   :  { %v1581_v10 = vrot.slane %v1580_v9, 4 }
 0xa1f   :  { %v1582_v11 = vmax.f32 %v1580_v9, %v1581_v10  ;;  %v4404_v9 = vld [vmem:[%s4613_s12 + $0x10] sm:$0xff]  ;;  %v4407_v10 = vld [vmem:[%s4613_s12 + $0x18] sm:$0xff] }
 0xa21   :  { %v1583_v12 = vrot.slane %v1582_v11, 2 }
 0xa23   :  { %v1584_v13 = vmax.f32 %v1582_v11, %v1583_v12  ;;  %v4410_v11 = vld [vmem:[%s4613_s12 + $0x20] sm:$0xff]  ;;  %v4413_v12 = vld [vmem:[%s4613_s12 + $0x28] sm:$0xff] }
 0xa25   :  { %v1585_v14 = vrot.slane %v1584_v13, 1 }
 0xa27   :  { %v1586_v15 = vmax.f32 %v1584_v13, %v1585_v14  ;;  %v4416_v13 = vld [vmem:[%s4613_s12 + $0x30] sm:$0xff]  ;;  %v4419_v14 = vld [vmem:[%s4613_s12 + $0x38] sm:$0xff] }
 0xa29   :  { %v1588_v17 = vmul.f32 %v1586_v15, %v4169_v23  ;;  %v1587_v19 = vmul.f32 %v1586_v15, %v4172_v24  ;;  %v4422_v15 = vld [vmem:[%s4614_s20] ss:$0 sm:$0xff] }
 0xa2b   :  { %v1592_v58 = vsel %vm572_vm12, %v1588_v17, 0.0  ;;  %v1589_v20 = vsel %vm272_vm2, %v1587_v19, 0.0  ;;  %v4425_v17 = vld [vmem:[%s4614_s20 + $0x1] ss:$0 sm:$0xff] }
 0xa2c   :  { %1593 = vadd.xlane.f32.xlu0 %v1592_v58  ;;  %1590 = vadd.xlane.f32.xlu1 %v1589_v20  ;;  %v4428_v19 = vld [vmem:[%s4615_s7] sm:$0xff]  ;;  %v4431_v58 = vld [vmem:[%s4615_s7 + $0x8] sm:$0xff] }
 0xa2d   :  { %v4434_v20 = vld [vmem:[%s4118_s21] ss:$0 sm:$0xff]  ;;  %s4618_s21 = sld [smem:[#allocation14_spill]] }
 0xab5   :  { %v1594_v55 = vpop.xlane.xlu0 %1593  ;;  %v1591_v21 = vpop.xlane.xlu1 %1590 }
 0xab6   :  { %v1596_v22 = vsub.f32 %v1565_v0, %v1594_v55  ;;  %v1595_v27 = vsub.f32 %v1564_v63, %v1591_v21  ;;  %v1935_v63 = vld [vmem:[%s4610_s19 + $0x8] sm:$0xff]  ;;  %v4437_v55 = vld [vmem:[%s4123_s30] sm:$0xff] }
 0xab7   :  { %v4440_v21 = vld [vmem:[%s4123_s30 + $0x8] sm:$0xff]  ;;  %s4619_s30 = sld [smem:[#allocation12_spill]] }
 0xab8   :  { %v1599_v28 = vmul.f32 1.442695, %v1596_v22  ;;  %v1597_v29 = vmul.f32 1.442695, %v1595_v27  ;;  %v4443_v22 = vld [vmem:[%s4128_s27] ss:$0 sm:$0xff] }
 0xab9   :  { %v4446_v27 = vld [vmem:[%s4616_s10 + $0x8] sm:$0xff]  ;;  %s4620_s27 = sld [smem:[#allocation19_spill]] }
 0xaba   :  { %3818 = vpow2.f32 %v1599_v28  ;;  %v4449_v28 = vld [vmem:[%s4616_s10] sm:$0xff] }
 0xabb   :  { %3820 = vpow2.f32 %v1597_v29  ;;  %v3354_v29 = vld [vmem:[%s4617_s11] ss:$0 sm:$0xff] }
 0xac7   :  { %v3819_v30 = vpop.eup %3818 }
 0xac8   :  { %3600 = vmatpush3.msk.msra.mxu0 %vm631_vm13, %v3819_v30  ;;  %v3821_v31 = vpop.eup %3820 }
 0xac9   :  { %3601 = vmatprep.subr.mxu0 %v3931_v2 }
 0xaca   :  { %3602 = vmatpush3.msra.mxu0 %v3821_v31 }
 0xacb   :  { %3604 = vmatmul.mubr.msk.f32.vlgmr.msra.gmra.mxu0 %vm627_vm14, %v4216_v25  ;;  %3611 = vmatprep.subr.mxu0 %v4296_v46 }
 0xacc   :  { %3612 = vmatpush3.msra.mxu0 %v4296_v46  ;;  %3613 = vmatprep.mubr.msk.f32.mxu0 %vm272_vm2, %v4162_v18 }
 0xacd   :  { %3623 = vmatprep.subr.mxu0 %v3931_v2 }
 0xacf   :  { %3614 = vmatmul.mubr.msk.f32.vlgmr.msra.gmra.mxu0 %vm272_vm2, %v4182_v26 }
 0xad0   :  { %3631 = vmatprep.mubr.msk.f32.mxu0 %vm3932_vm0, %v3931_v2  ;;  %3624 = vmatpush3.msra.mxu0 %v1927_v47 }
 0xad1   :  { %3625 = vmatprep.subr.mxu0 %v3931_v2 }
 0xb8b   :  { %v1670_v24 = vpop.f32.mrf.mxu0 }
 0xb8c   :  { %3606 = vmatprep.subr.mxu1 %v1670_v24 }
 0xb8d   :  { %v3605_v32 = vpop.f32.mrf.mxu0  ;;  %3607 = vmatpush3.msra.mxu1 %v1670_v24 }
 0xb8e   :  { %3609 = vmatmul.mubr.msk.f32.vlgmr.msra.gmra.mxu1 %vm272_vm2, %v4169_v23  ;;  %3616 = vmatprep.subr.mxu1 %v3931_v2 }
 0xb8f   :  { %3620 = vmatprep.mubr.msk.f32.mxu1 %vm3932_vm0, %v3931_v2  ;;  %v3615_v23 = vpop.f32.mrf.mxu0 }
 0xb91   :  { %v1819_v40 = vpop.f32.mrf.mxu0 }
 0xc4e   :  { %v3610_v18 = vpop.f32.mrf.mxu1 }
 0xc4f   :  { %3822 = vrcp.f32 %v3610_v18 }
 0xc50   :  { %v1740_v33 = vpop.f32.mrf.mxu1 }
 0xc51   :  { %3824 = vrcp.f32 %v1740_v33 }
 0xc5c   :  { %v3823_v26 = vpop.eup %3822 }
 0xc5d   :  { %v1752_v34 = vmul.f32 %v3823_v26, %v3819_v30  ;;  %v3357_v26 = vld [vmem:[%s4617_s11 + $0x1] ss:$0 sm:$0xff] }
 0xc5e   :  { %v3825_v35 = vpop.eup %3824 }
 0xc5f   :  { %1835 = vperm.xlu0 %3796, %v1752_v34   ;;  %v1751_v36 = vmul.f32 %v3825_v35, %v3821_v31 }
 0xc63   :  { %1830 = vperm.xlu0 %3796, %v1751_v36  }
 0xc67   :  { %1940 = vrot.lane.b32.xlu0 %v4288_v43, %s3934_s0 }
 0xc6b   :  { %186 = vperm.xlu0 %3796, %v184_v37  }
 0xcda   :  { %v1836_v38 = vpop.permute.xlu0 %1835 }
 0xcdb   :  { %v1839_v39 = vmul.f32 %v3615_v23, %v1836_v38 }
 0xcdd   :  { %3617 = vmatpush3.msk.msra.mxu1 %vm631_vm13, %v1839_v39 }
 0xcde   :  { %v1831_v41 = vpop.permute.xlu0 %1830  ;;  %3618 = vmatprep.subr.mxu1 %v3931_v2 }
 0xcdf   :  { %v1838_v42 = vmul.f32 %v1831_v41, %v1819_v40  ;;  %v3360_v41 = vld [vmem:[%s4618_s21] ss:$0 sm:$0xff] }
 0xce1   :  { %3619 = vmatpush3.msra.mxu1 %v1838_v42 }
 0xce2   :  { %v1941_v44 = vpop.permute.xlu0 %1940  ;;  %3621 = vmatmul.mubr.msk.f32.vlgmr.msra.gmra.mxu1 %vm627_vm14, %v4216_v25  ;;  %3634 = vmatprep.subr.mxu1 %v3931_v2  ;;  %v1926_v25 = vld [vmem:[%s4607_s3 + $0x10] sm:$0xff] }
 0xce3   :  { %3642 = vmatprep.mubr.msk.f32.mxu1 %vm3932_vm0, %v3931_v2  ;;  %3635 = vmatpush3.msra.mxu1 %v1931_v48 }
 0xce4   :  { %3636 = vmatprep.subr.mxu1 %v3931_v2  ;;  %3626 = vmatpush3.msra.mxu0 %v1926_v25 }
 0xce5   :  { %3637 = vmatpush3.msra.mxu1 %v1930_v49  ;;  %3627 = vmatprep.subr.mxu0 %v3931_v2 }
 0xce6   :  { %v187_v45 = vpop.permute.xlu0 %186  ;;  %3638 = vmatprep.subr.mxu1 %v3931_v2 }
 0xce7   :  { %vm188_vm6 = vcmp.eq.s32.totalorder %v4158_v16, %v187_v45  ;;  %v1925_v16 = vld [vmem:[%s4607_s3 + $0x8] sm:$0xff]  ;;  %3639 = vmatpush3.msra.mxu1 %v1929_v3 }
 0xce8   :  { %v4349_v46 = vsel %vm188_vm6, 1.0, %v3931_v2  ;;  %3628 = vmatpush3.msra.mxu0 %v1925_v16  ;;  %3640 = vmatprep.subr.mxu1 %v3931_v2 }
 0xce9   :  { %2274 = vxpose.xlu0.b32.start.end [1/1] (short) (narrow) %v4349_v46, 8  ;;  %3629 = vmatprep.subr.mxu0 %v3931_v2 }
 0xcea   :  { %3630 = vmatpush3.msra.mxu0 %v1924_v50  ;;  %3641 = vmatpush3.msra.mxu1 %v1928_v51 }
 0xceb   :  { %3645 = vmatprep.subr.mxu0 %v3931_v2  ;;  %3652 = vmatprep.subr.mxu1 %v3931_v2 }
 0xda2   :  { %v1915_v53 = vpop.f32.mrf.mxu1 }
 0xda3   :  { %v1916_v54 = vadd.f32 %v3350_v52, %v1915_v53 }
 0xda4   :  { %v3622_v56 = vpop.f32.mrf.mxu1 }
 0xda5   :  { %v1920_v57 = vmul.f32 1.442695, %v1916_v54  ;;  %vm1919_vm7 = vcmp.gt.f32.partialorder %v1916_v54, 0.0  ;;  %v4459_v56 = vpop.trf.xlu0 }
 0xda7   :  { %3826 = vpow2.f32 %v1920_v57  ;;  %v3366_v57 = vld [vmem:[%s4620_s27] ss:$0 sm:$0xff] }
 0xdb4   :  { %v3827_v59 = vpop.eup %3826 }
 0xdb5   :  { %v3353_v60 = vadd.f32 -1.0, %v3827_v59 }
 0xdb7   :  { %v1923_v61 = vsel %vm1919_vm7, %v1916_v54, %v3353_v60 }
 0xdb8   :  { %v1943_v0 = vsel %vm198_vm1, %v1923_v61, %v1941_v44  ;;  %v3362_v44 = vld [vmem:[%s4619_s30] ss:$0 sm:$0xff] }
 0xdb9   :  { %3632 = vmatmul.mubr.msk.f32.vlgmr.msra.gmra.mxu0 %vm987_vm3, %v1943_v0  ;;  %3643 = vmatmul.mubr.msk.f32.vlgmr.msra.gmra.mxu1 %vm987_vm3, %v1943_v0 }
 0xdba   :  { %3646 = vmatpush3.msra.mxu0 %v1938_v62  ;;  %3653 = vmatpush3.msra.mxu1 %v1935_v63 }
 0xdbb   :  { %3647 = vmatprep.subr.mxu0 %v3931_v2  ;;  %3654 = vmatprep.subr.mxu1 %v3931_v2 }
 0xdbc   :  { %3648 = vmatpush3.msra.mxu0 %v1937_v1  ;;  %3649 = vmatprep.mubr.msk.f32.mxu0 %vm3932_vm0, %v3931_v2 }
 0xdbd   :  { %3655 = vmatpush3.msra.mxu1 %v1934_v4  ;;  %3656 = vmatprep.mubr.msk.f32.mxu1 %vm3932_vm0, %v3931_v2 }
 0xdbe   :  { %3650 = vmatmul.mubr.msk.f32.vlgmr.msra.gmra.mxu0 %vm198_vm1, %v4288_v43  ;;  %3657 = vmatmul.mubr.msk.f32.vlgmr.msra.gmra.mxu1 %vm198_vm1, %v1923_v61 }
 0xdbf   :  { %3664 = vmatprep.subr.mxu1 %v3931_v2  ;;  %3659 = vmatprep.subr.mxu0 %v3931_v2 }
 0xdc0   :  { %3668 = vmatprep.mubr.msk.f32.mxu1 %vm3932_vm0, %v3931_v2  ;;  %3661 = vmatprep.mubr.msk.f32.mxu0 %vm3932_vm0, %v3931_v2 }
 0xdc1   :  { %3665 = vmatpush3.msra.mxu1 %v4446_v27 }
 0xdc2   :  { %3666 = vmatprep.subr.mxu1 %v3931_v2 }
 0xdc3   :  { %3667 = vmatpush3.msra.mxu1 %v4449_v28 }
 0xe79   :  { %v2019_v30 = vpop.f32.mrf.mxu0  ;;  %v2101_v31 = vpop.f32.mrf.mxu1 }
 0xe7a   :  { %v2020_v24 = vadd.f32 %v3354_v29, %v2019_v30  ;;  %v2102_v36 = vadd.f32 %v3357_v26, %v2101_v31 }
 0xe7b   :  { %v3633_v32 = vpop.f32.mrf.mxu0  ;;  %v3644_v18 = vpop.f32.mrf.mxu1 }
 0xe7c   :  { %v3356_v33 = vmul.f32 -1.442695, %v2020_v24  ;;  %v3359_v38 = vmul.f32 -1.442695, %v2102_v36 }
 0xe7e   :  { %3828 = vpow2.f32 %v3356_v33  ;;  %v2183_v34 = vpop.f32.mrf.mxu0  ;;  %v2262_v35 = vpop.f32.mrf.mxu1 }
 0xe7f   :  { %3830 = vpow2.f32 %v3359_v38  ;;  %v2184_v45 = vadd.f32 %v3360_v41, %v2183_v34  ;;  %v2263_v25 = vadd.f32 %v3362_v44, %v2262_v35 }
 0xe80   :  { %v3651_v37 = vpop.f32.mrf.mxu0  ;;  %v3658_v23 = vpop.f32.mrf.mxu1 }
 0xe8b   :  { %v3829_v2 = vpop.eup %3828 }
 0xe8c   :  { %v2026_v39 = vadd.f32 1.0, %v3829_v2  ;;  %v3831_v40 = vpop.eup %3830 }
 0xe8d   :  { %v2108_v42 = vadd.f32 1.0, %v3831_v40 }
 0xe8e   :  { %3832 = vrcp.f32 %v2026_v39 }
 0xe8f   :  { %3834 = vrcp.f32 %v2108_v42 }
 0xe9b   :  { %v3833_v47 = vpop.eup %3832 }
 0xe9c   :  { %v2266_v48 = vmul.f32 %v3833_v47, %v2184_v45  ;;  %v3835_v16 = vpop.eup %3834 }
 0xe9d   :  { %v2269_v3 = vsub.f32 1.0, %v3835_v16  ;;  %v2271_v52 = vmul.f32 %v3835_v16, %v4288_v43 }
 0xe9e   :  { %v2267_v49 = vadd.f32 %v2266_v48, %v2263_v25 }
 0xea0   :  { %3836 = vtanh.f32 %v2267_v49 }
 0xead   :  { %v3837_v50 = vpop.eup %3836 }
 0xeae   :  { %v2270_v51 = vmul.f32 %v3837_v50, %v2269_v3 }
 0xeb0   :  { %v2272_v53 = vadd.f32 %v2271_v52, %v2270_v51 }
 0xeb2   :  { %v2273_v54 = vmax.f32 %v2272_v53, 0.0 }
 0xeb4   :  { %3660 = vmatpush3.msra.mxu0 %v2273_v54  ;;  %3669 = vmatmul.mubr.msk.f32.vlgmr.msra.gmra.mxu1 %vm198_vm1, %v2273_v54 }
 0xeb5   :  { %3662 = vmatmul.mubr.msk.f32.vlgmr.msra.gmra.mxu0 %vm272_vm2, %v4459_v56 }
 0xf74   :  { %v4465_v59 = vpop.f32.mrf.mxu1 }
 0xf75   :  { %v2480_v60 = vmul.f32 %v3366_v57, %v4465_v59  ;;  %v2375_v61 = vpop.f32.mrf.mxu0 }
 0xf76   :  { %v3670_v62 = vpop.f32.mrf.mxu1  ;;  %v2379_v63 = vmax.f32 %v2375_v61, 0.0  }
 0xf77   :  { %v2481_v43 = vsel %vm198_vm1, %v2480_v60, 0.0  ;;  %v3663_v0 = vpop.f32.mrf.mxu0 }
 0xf78   :  { %2482 = vadd.xlane.f32.xlu1 %v2481_v43 }
0x1001   :  { %v4469_v1 = vpop.xlane.xlu1 %2482 }
0x1002 LB: > { %v3935_v4 = vmov 0.0   ;;  %vm3936_vm0 = vmmov 0   ;;  %vm2571_vm8 = vcmask 123904   ;;  %vm2579_vm9 = vcmask 1041408   ;;  %s3938_s16 = smov 16   ;;  %s2489_s15 = sadd.s32 1, %s3892_s15   ;;  %s3892_s15 = sphi %s4473_s15, %s2489_s15   ;;  %v3888_v63 = vphi %v2379_v63, %v4621_v63  }
0x1003   : > { %3671 = vmatprep.subr.mxu0 %v3935_v4  ;;  %3675 = vmatprep.mubr.msk.f32.mxu0 %vm3936_vm0, %v3935_v4  ;;  %vm2575_vm10 = vcmask 15360   ;;  %v3937_v18 = vmov 0   ;;  %v3371_v37 = vadd.f32 -1.0, %v4349_v46  ;;  %p2486_p0 = scmp.ge.s32.totalorder %s2489_s15, 2  }
0x1004   : > { %3672 = vmatpush3.msra.mxu0 %v4446_v27  ;;  %3678 = vmatprep.subr.mxu1 %v3935_v4  ;;  %s3939_s18 = smov (%p2486_p0), [#allocation2]  }
0x1005   : > { %3673 = vmatprep.subr.mxu0 %v3935_v4  ;;  %3680 = vmatprep.mubr.msk.f32.mxu1 %vm3936_vm0, %v3935_v4  ;;  %v2658_v23 = vmul.f32 1e+30, %v3371_v37  ;;  %s3253_s22 = sshll.u32 (%p2486_p0), %s3939_s18, 4  ;;  %s3254_s22 = int_to_ptr.vmem [resolvable:$true] %s3253_s22 }
0x1006   : > { %3674 = vmatpush3.msra.mxu0 %v4449_v28  ;;  %3838 = vset.pattern.permute.xlu0 %v3937_v18  ;;  %s3856_s23 = scalar_lea.vmem (%p2486_p0), %s3254_s22, 32  ;;  %p3861_p2 = scmp.lt.s32.totalorder (%p2486_p0), %s3254_s22, %s3254_s22 }
0x1007   : > { %3676 = vmatmul.mubr.msk.f32.vlgmr.msra.gmra.mxu0 %vm198_vm1, %v3888_v63  ;;  %3688 = vmatprep.subr.mxu0 %v3935_v4  ;;  %p3857_p1 = scmp.ne.s32.totalorder (%p2486_p0), %s3254_s22, %s3856_s23  ;;  %p3862_p3 = scmp.lt.s32.totalorder (%p2486_p0), %s3856_s23, %s3856_s23 }
0x1008   : > { %3690 = vmatprep.mubr.msk.f32.mxu0 %vm3936_vm0, %v3935_v4  ;;  %3839 = vset.pattern.permute.xlu1 %v3937_v18 }
0x1009   :  { %p3863_p4 = por (%p2486_p0), %p3862_p3, %p3861_p2 }
0x100b   :  { %p3864_p5 = pnand (%p2486_p0), %p3863_p4, %p3857_p1 }
0x10c7   : > { %v2560_v29 = vpop.f32.mrf.mxu0 }
0x10c8   : > { %v2570_v30 = vmul.f32 %v4392_v5, %v2560_v29 }
0x10c9   : > { %v3677_v31 = vpop.f32.mrf.mxu0 }
0x10ca   : > { %v2572_v24 = vsel %vm2571_vm8, %v2570_v30, 0.0 }
0x10cb   : > { %2573 = vadd.xlane.f32.xlu0 %v2572_v24 }
0x1154   : > { %v2574_v32 = vpop.xlane.xlu0 %2573 }
0x1155   : > { %3679 = vmatpush3.msk.msra.mxu1 %vm2579_vm9, %v2574_v32 }
0x1156   : > { %3681 = vmatmul.mubr.msk.f32.vlgmr.msra.gmra.mxu1 %vm2575_vm10, %v4349_v46  ;;  %3683 = vmatprep.subr.mxu1 %v3935_v4 }
0x1157   : > { %3685 = vmatprep.mubr.msk.f32.mxu1 %vm3936_vm0, %v3935_v4 }
0x1216   : > { %v2649_v33 = vpop.f32.mrf.mxu1 }
0x1217   : > { %v2653_v26 = vadd.f32 %v2649_v33, %v4469_v1 }
0x1218   : > { %v3682_v34 = vpop.f32.mrf.mxu1 }
0x1219   : > { %v2655_v35 = vmul.f32 0.01, %v2653_v26  ;;  %vm2654_vm11 = vcmp.gt.f32.partialorder %v2653_v26, 0.0 }
0x121b   : > { %v2656_v36 = vsel %vm2654_vm11, %v2653_v26, %v2655_v35 }
0x121c   : > { %2661 = vperm.xlu0 %3838, %v2656_v36  }
0x1297   : > { %v2662_v38 = vpop.permute.xlu0 %2661 }
0x1298   : > { %v2664_v2 = vadd.f32 %v2662_v38, %v2658_v23 }
0x129a   : > { %v2665_v39 = vsel %vm2575_vm10, %v2664_v2, -inf }
0x129b   : > { %v2666_v40 = vrot.slane %v2665_v39, 4 }
0x129d   : > { %v2667_v41 = vmax.f32 %v2665_v39, %v2666_v40 }
0x129f   : > { %v2668_v42 = vrot.slane %v2667_v41, 2 }
0x12a1   : > { %v2669_v44 = vmax.f32 %v2667_v41, %v2668_v42 }
0x12a3   : > { %v2670_v45 = vrot.slane %v2669_v44, 1 }
0x12a5   : > { %v2671_v47 = vmax.f32 %v2669_v44, %v2670_v45 }
0x12a7   : > { %v2672_v48 = vmul.f32 %v2671_v47, %v4349_v46 }
0x12a9   : > { %v2673_v25 = vsel %vm2575_vm10, %v2672_v48, 0.0 }
0x12aa   : > { %2674 = vadd.xlane.f32.xlu1 %v2673_v25 }
0x1333   : > { %v2675_v49 = vpop.xlane.xlu1 %2674 }
0x1334   : > { %v2676_v16 = vsub.f32 %v2656_v36, %v2675_v49 }
0x1336   : > { %v2677_v3 = vmul.f32 1.442695, %v2676_v16 }
0x1338   : > { %3840 = vpow2.f32 %v2677_v3 }
0x1345   : > { %v3841_v50 = vpop.eup %3840 }
0x1346   : > { %3684 = vmatpush3.msra.mxu1 %v3841_v50 }
0x1347   : > { %3686 = vmatmul.mubr.msk.f32.vlgmr.msra.gmra.mxu1 %vm272_vm2, %v4459_v56  ;;  %3693 = vmatprep.subr.mxu1 %v3935_v4 }
0x1348   : > { %3695 = vmatprep.mubr.msk.f32.mxu1 %vm3936_vm0, %v3935_v4 }
0x1407   : > { %v2745_v51 = vpop.f32.mrf.mxu1 }
0x1408   : > { %3689 = vmatpush3.msk.msra.mxu0 %vm2579_vm9, %v2745_v51 }
0x1409   : > { %v3687_v52 = vpop.f32.mrf.mxu1  ;;  %3691 = vmatmul.mubr.msk.f32.vlgmr.msra.gmra.mxu0 %vm2575_vm10, %v4349_v46  ;;  %3698 = vmatprep.subr.mxu0 %v3935_v4 }
0x140a   : > { %3699 = vmatpush3.msra.mxu0 %v4407_v10  ;;  %3706 = vmatprep.mubr.msk.f32.mxu0 %vm3936_vm0, %v3935_v4 }
0x140b   : > { %3700 = vmatprep.subr.mxu0 %v3935_v4 }
0x140c   : > { %3701 = vmatpush3.msra.mxu0 %v4404_v9 }
0x140d   : > { %3702 = vmatprep.subr.mxu0 %v3935_v4 }
0x140e   : > { %3703 = vmatpush3.msra.mxu0 %v4401_v8 }
0x140f   : > { %3704 = vmatprep.subr.mxu0 %v3935_v4 }
0x1410   : > { %3705 = vmatpush3.msra.mxu0 %v4398_v7 }
0x1411   : > { %3720 = vmatprep.subr.mxu0 %v3935_v4 }
0x14c9   : > { %v2818_v53 = vpop.f32.mrf.mxu0 }
0x14ca   : > { %3842 = vrcp.f32 %v2818_v53 }
0x14cb   : > { %v3692_v54 = vpop.f32.mrf.mxu0 }
0x14d7   : > { %v3843_v57 = vpop.eup %3842 }
0x14d8   : > { %v2823_v60 = vmul.f32 %v3843_v57, %v3841_v50 }
0x14da   : > { %2826 = vperm.xlu1 %3839, %v2823_v60  }
0x14de   : > { %2911 = vrot.lane.b32.xlu1 %v3888_v63, %s3938_s16 }
0x1555   : > { %v2827_v61 = vpop.permute.xlu1 %2826 }
0x1556   : > { %v2829_v62 = vmul.f32 %v2827_v61, %v4465_v59 }
0x1558   : > { %3694 = vmatpush3.msra.mxu1 %v2829_v62 }
0x1559   : > { %3696 = vmatmul.mubr.msk.f32.vlgmr.msra.gmra.mxu1 %vm272_vm2, %v4459_v56  ;;  %3709 = vmatprep.subr.mxu1 %v3935_v4  ;;  %v2912_v32 = vpop.permute.xlu1 %2911 }
0x155a   : > { %3710 = vmatpush3.msra.mxu1 %v4419_v14  ;;  %3717 = vmatprep.mubr.msk.f32.mxu1 %vm3936_vm0, %v3935_v4 }
0x155b   : > { %3711 = vmatprep.subr.mxu1 %v3935_v4 }
0x155c   : > { %3712 = vmatpush3.msra.mxu1 %v4416_v13 }
0x155d   : > { %3713 = vmatprep.subr.mxu1 %v3935_v4 }
0x155e   : > { %3714 = vmatpush3.msra.mxu1 %v4413_v12 }
0x155f   : > { %3715 = vmatprep.subr.mxu1 %v3935_v4 }
0x1560   : > { %3716 = vmatpush3.msra.mxu1 %v4410_v11 }
0x1561   : > { %3727 = vmatprep.subr.mxu1 %v3935_v4 }
0x1619   : > { %v2902_v43 = vpop.f32.mrf.mxu1 }
0x161a   : > { %v2903_v0 = vadd.f32 %v4395_v6, %v2902_v43 }
0x161b   : > { %v3697_v29 = vpop.f32.mrf.mxu1 }
0x161c   : > { %v2907_v30 = vmul.f32 1.442695, %v2903_v0  ;;  %vm2906_vm12 = vcmp.gt.f32.partialorder %v2903_v0, 0.0 }
0x161e   : > { %3844 = vpow2.f32 %v2907_v30 }
0x162b   : > { %v3845_v31 = vpop.eup %3844 }
0x162c   : > { %v3377_v24 = vadd.f32 -1.0, %v3845_v31 }
0x162e   : > { %v2910_v18 = vsel %vm2906_vm12, %v2903_v0, %v3377_v24 }
0x162f   : > { %v2914_v33 = vsel %vm198_vm1, %v2910_v18, %v2912_v32 }
0x1630   : > { %3707 = vmatmul.mubr.msk.f32.vlgmr.msra.gmra.mxu0 %vm987_vm3, %v2914_v33  ;;  %3718 = vmatmul.mubr.msk.f32.vlgmr.msra.gmra.mxu1 %vm987_vm3, %v2914_v33 }
0x1631   : > { %3728 = vmatpush3.msra.mxu1 %v4431_v58  ;;  %3731 = vmatprep.mubr.msk.f32.mxu1 %vm3936_vm0, %v3935_v4 }
0x1632   : > { %3729 = vmatprep.subr.mxu1 %v3935_v4  ;;  %3721 = vmatpush3.msra.mxu0 %v4440_v21 }
0x1633   : > { %3730 = vmatpush3.msra.mxu1 %v4428_v19  ;;  %3722 = vmatprep.subr.mxu0 %v3935_v4 }
0x1634   : > { %3732 = vmatmul.mubr.msk.f32.vlgmr.msra.gmra.mxu1 %vm198_vm1, %v2910_v18  ;;  %3723 = vmatpush3.msra.mxu0 %v4437_v55 }
0x1635   : > { %3724 = vmatprep.mubr.msk.f32.mxu0 %vm3936_vm0, %v3935_v4 }
0x1636   : > { %3725 = vmatmul.mubr.msk.f32.vlgmr.msra.gmra.mxu0 %vm198_vm1, %v3888_v63 }
0x16f0   : > { %v2990_v26 = vpop.f32.mrf.mxu0  ;;  %v3072_v34 = vpop.f32.mrf.mxu1 }
0x16f1   : > { %v2991_v35 = vadd.f32 %v4422_v15, %v2990_v26  ;;  %v3073_v40 = vadd.f32 %v4425_v17, %v3072_v34 }
0x16f2   : > { %v3708_v36 = vpop.f32.mrf.mxu0  ;;  %v3719_v37 = vpop.f32.mrf.mxu1 }
0x16f3   : > { %v3380_v23 = vmul.f32 -1.442695, %v2991_v35  ;;  %v3383_v42 = vmul.f32 -1.442695, %v3073_v40 }
0x16f4   : > { %v3233_v38 = vpop.f32.mrf.mxu1 }
0x16f5   : > { %3846 = vpow2.f32 %v3380_v23  ;;  %v3234_v49 = vadd.f32 %v4434_v20, %v3233_v38 }
0x16f6   : > { %v3733_v2 = vpop.f32.mrf.mxu1  ;;  %v3154_v39 = vpop.f32.mrf.mxu0  ;;  %3848 = vpow2.f32 %v3383_v42 }
0x16f7   : > { %v3155_v48 = vadd.f32 %v4443_v22, %v3154_v39 }
0x16f8   : > { %v3726_v41 = vpop.f32.mrf.mxu0 }
0x1702   : > { %v3847_v4 = vpop.eup %3846 }
0x1703   : > { %v2997_v44 = vadd.f32 1.0, %v3847_v4  ;;  %v3849_v45 = vpop.eup %3848 }
0x1704   : > { %v3079_v47 = vadd.f32 1.0, %v3849_v45 }
0x1705   : > { %3850 = vrcp.f32 %v2997_v44 }
0x1706   : > { %3852 = vrcp.f32 %v3079_v47 }
0x1712   : > { %v3851_v25 = vpop.eup %3850 }
0x1713   : > { %v3237_v16 = vmul.f32 %v3851_v25, %v3155_v48  ;;  %v3853_v50 = vpop.eup %3852 }
0x1714   : > { %v3240_v51 = vsub.f32 1.0, %v3853_v50  ;;  %v3242_v53 = vmul.f32 %v3888_v63, %v3853_v50 }
0x1715   : > { %v3238_v3 = vadd.f32 %v3237_v16, %v3234_v49 }
0x1717   : > { %3854 = vtanh.f32 %v3238_v3 }
0x1724   : > { %v3855_v52 = vpop.eup %3854 }
0x1725   : > { %v3241_v54 = vmul.f32 %v3855_v52, %v3240_v51 }
0x1727   : > { %v3243_v57 = vadd.f32 %v3242_v53, %v3241_v54  ;;  %2488 = sbr.rel (!%p2486_p0) target bundleno = 4098 (0x1002), region = 212 }
0x1729   : > { %v3244_v60 = vmax.f32 %v3243_v57, 0.0  }
0x172b   : > { %v4621_v63 = vmov %v3244_v60  ;;  %3246 = vst.msk [vmem:[#allocation2] sm:$0x3] (%p2486_p0), %vm2571_vm8, %v3244_v60 }
0x172c   :  { %3867 = shalt.err (!%p3864_p5)
}
0x172d   :  { %3256 = dma.vmem_to_hbm [thread:$0]  %s3254_s22, 32, %s4133_s4, [#allocation3]  }
0x172e   :  { %3884 = dma.done.wait [#allocation3], 32  }
0x172f   :  { %3885 = vsyncadd [#allocation3], 4294967264 }
0x1730   :  { %3260 = vsyncpa [#allocation3], 1 }

</bundles_post_ra>
